<compile_context>
chip_gen: v7x
topology: tpu7x:2x2x1
jax: 0.10.0
libtpu: 0.0.40
codegen_flags: <defaults>
</compile_context>

<pallas_src>
import functools
import math

import jax
import jax.numpy as jnp
from jax.experimental import pallas as pl
from jax.experimental.pallas import tpu as pltpu


# ----------------------------------------------------------------------------
# Pallas kernels
# ----------------------------------------------------------------------------
def _conv_bn_kernel(p_ref, w_ref, s_ref, b_ref, o_ref, *, relu):
    # p_ref: (TM, K) bf16, w_ref: (K, Cout) bf16, s/b: (1, Cout) f32, o: (TM, Cout) bf16
    acc = jnp.dot(p_ref[...], w_ref[...], preferred_element_type=jnp.float32)
    y = acc * s_ref[...] + b_ref[...]
    if relu:
        y = jnp.maximum(y, 0.0)
    o_ref[...] = y.astype(o_ref.dtype)


def _conv_bn_add_relu_kernel(p_ref, w_ref, s_ref, b_ref, r_ref, o_ref):
    # conv3 of each bottleneck: conv + BN + residual add + ReLU fused in one epilogue.
    acc = jnp.dot(p_ref[...], w_ref[...], preferred_element_type=jnp.float32)
    y = acc * s_ref[...] + b_ref[...] + r_ref[...].astype(jnp.float32)
    o_ref[...] = jnp.maximum(y, 0.0).astype(o_ref.dtype)


def _maxpool9_kernel(*refs):
    # 9 shifted views of the padded input -> elementwise max.
    o_ref = refs[-1]
    acc = refs[0][...]
    for r in refs[1:-1]:
        acc = jnp.maximum(acc, r[...])
    o_ref[...] = acc


# ----------------------------------------------------------------------------
# Tiling helpers + memoized pallas_call builders (one build per unique shape)
# ----------------------------------------------------------------------------
def _pick_m_tile(m, k_lanes, byte_budget=8 << 20):
    """Largest power-of-two M tile (<=512) dividing m, capped so one double-buffered
    bf16 patch block stays under `byte_budget` (keeps total live VMEM < ~24 MiB)."""
    cap = 512
    while cap > 64 and cap * k_lanes * 4 > byte_budget:   # 2 buffers x bf16
        cap //= 2
    t = cap
    while t > 8 and m % t:
        t //= 2
    return t if (t > 0 and m % t == 0) else m


@functools.lru_cache(maxsize=None)
def _build_conv_call(m, k, cout, tm, relu, fuse_residual):
    if fuse_residual:
        kernel = _conv_bn_add_relu_kernel
    else:
        kernel = functools.partial(_conv_bn_kernel, relu=relu)

    p_spec = pl.BlockSpec((tm, k), lambda i: (i, 0))
    w_spec = pl.BlockSpec((k, cout), lambda i: (0, 0))      # resident across M tiles
    v_spec = pl.BlockSpec((1, cout), lambda i: (0, 0))      # resident across M tiles
    o_spec = pl.BlockSpec((tm, cout), lambda i: (i, 0))

    in_specs = [p_spec, w_spec, v_spec, v_spec]
    if fuse_residual:
        in_specs.append(pl.BlockSpec((tm, cout), lambda i: (i, 0)))

    return pl.pallas_call(
        kernel,
        out_shape=jax.ShapeDtypeStruct((m, cout), jnp.bfloat16),
        grid=(m // tm,),
        in_specs=in_specs,
        out_specs=o_spec,
        compiler_params=pltpu.CompilerParams(dimension_semantics=("parallel",)),
    )


@functools.lru_cache(maxsize=None)
def _build_maxpool_call(m, c, tm):
    spec = pl.BlockSpec((tm, c), lambda i: (i, 0))
    return pl.pallas_call(
        _maxpool9_kernel,
        out_shape=jax.ShapeDtypeStruct((m, c), jnp.bfloat16),
        grid=(m // tm,),
        in_specs=[spec] * 9,
        out_specs=spec,
        compiler_params=pltpu.CompilerParams(dimension_semantics=("parallel",)),
    )


# ----------------------------------------------------------------------------
# Glue: im2col (3x3 / 7x7 only), conv wrapper, max pool
# ----------------------------------------------------------------------------
def _im2col(x, kh, kw, stride, pad):
    n, h, w, c = x.shape
    xp = jnp.pad(x, ((0, 0), (pad, pad), (pad, pad), (0, 0)))
    oh = (h + 2 * pad - kh) // stride + 1
    ow = (w + 2 * pad - kw) // stride + 1
    slabs = []
    for i in range(kh):
        for j in range(kw):
            slabs.append(
                xp[:, i : i + (oh - 1) * stride + 1 : stride,
                      j : j + (ow - 1) * stride + 1 : stride, :]
            )
    # (N,OH,OW,KH*KW,C) -> (M, KH*KW*C); K-order = (kernel position, input channel),
    # matching the packed (block-diagonal) weight layout.
    p = jnp.stack(slabs, axis=3).reshape(n * oh * ow, kh * kw * c)
    return p, oh, ow


def conv_bn(x, p, *, kh=1, kw=1, stride=1, pad=0, relu=True, residual=None):
    """Conv2d (bias=False; groups folded into a block-diagonal weight) + folded BN
    (+ ReLU) (+ fused residual add & ReLU).  x: (N,H,W,Cin) bf16 NHWC."""
    n, h, w, cin = x.shape
    wk, scale, bias = p["w"], p["scale"], p["bias"]
    k, cout = wk.shape

    if kh == 1 and kw == 1:
        xs = x[:, ::stride, ::stride, :] if stride != 1 else x
        oh, ow = xs.shape[1], xs.shape[2]
        patches = xs.reshape(n * oh * ow, cin)
    else:
        patches, oh, ow = _im2col(x, kh, kw, stride, pad)

    m = n * oh * ow
    patches = patches.astype(jnp.bfloat16)
    tm = _pick_m_tile(m, k)

    fuse = residual is not None
    call = _build_conv_call(m, k, cout, tm, bool(relu), fuse)
    args = [patches, wk, scale, bias]
    if fuse:
        args.append(residual.reshape(m, cout).astype(jnp.bfloat16))
    out = call(*args)
    return out.reshape(n, oh, ow, cout)


def maxpool_3x3_s2(x):
    n, h, w, c = x.shape
    xp = jnp.pad(x, ((0, 0), (1, 1), (1, 1), (0, 0)), constant_values=-jnp.inf)
    oh = (h - 1) // 2 + 1
    ow = (w - 1) // 2 + 1
    slabs = []
    for i in range(3):
        for j in range(3):
            slabs.append(
                xp[:, i : i + 2 * (oh - 1) + 1 : 2,
                      j : j + 2 * (ow - 1) + 1 : 2, :].reshape(n * oh * ow, c)
            )
    m = n * oh * ow
    tm = _pick_m_tile(m, c)
    out = _build_maxpool_call(m, c, tm)(*slabs)
    return out.reshape(n, oh, ow, c)


# ----------------------------------------------------------------------------
# Synthetic deterministic parameters (Conv weight + folded inference BatchNorm),
# packed into kernel-ready (K, Cout) bf16 weights at init time.
# ----------------------------------------------------------------------------
def _init_conv_bn(key, cin, cout, kh, kw, groups=1):
    cin_g = cin // groups
    k1, k2, k3, k4, k5 = jax.random.split(key, 5)
    fan_in = cin_g * kh * kw
    w = jax.random.normal(k1, (cout, cin_g, kh, kw), jnp.float32) / math.sqrt(fan_in)
    gamma = 1.0 + 0.1 * jax.random.normal(k2, (cout,), jnp.float32)
    beta = 0.1 * jax.random.normal(k3, (cout,), jnp.float32)
    mean = 0.1 * jax.random.normal(k4, (cout,), jnp.float32)
    var = 1.0 + 0.1 * jax.random.uniform(k5, (cout,), jnp.float32)
    scale = gamma / jnp.sqrt(var + 1e-5)
    bias = beta - mean * scale

    if groups == 1:
        wk = jnp.transpose(w, (2, 3, 1, 0)).reshape(kh * kw * cin, cout)
    else:
        g, ng = groups, cout // groups
        # (Cout, Cin_g, KH, KW) -> (KH, KW, G, Cin_g, Ng), then block-diagonal over G
        # so a single (K = KH*KW*Cin, Cout) matmul implements the grouped conv.
        wg = w.reshape(g, ng, cin_g, kh, kw).transpose(3, 4, 0, 2, 1)
        eye = jnp.eye(g, dtype=w.dtype)
        wk = (wg[:, :, :, :, None, :] * eye[None, None, :, None, :, None]
              ).reshape(kh * kw * cin, cout)

    return {
        "w": wk.astype(jnp.bfloat16),
        "scale": scale.reshape(1, cout),
        "bias": bias.reshape(1, cout),
    }


# ResNeXt-101 32x4d configuration (stages 1..3 only — the "fork" stops at layer3).
CARDINALITY = 32
STEM_C = 64
# (num_blocks, mid_channels, out_channels, stride_of_first_block)
STAGES = ((3, 128, 256, 1), (4, 256, 512, 2), (23, 512, 1024, 2))


def _init_block(key, cin, mid, cout, groups, stride):
    ks = jax.random.split(key, 4)
    block = {
        "conv1": _init_conv_bn(ks[0], cin, mid, 1, 1),
        "conv2": _init_conv_bn(ks[1], mid, mid, 3, 3, groups=groups),
        "conv3": _init_conv_bn(ks[2], mid, cout, 1, 1),
    }
    if stride != 1 or cin != cout:
        block["down"] = _init_conv_bn(ks[3], cin, cout, 1, 1)
    return block


def init_params(key):
    params = {"stem": _init_conv_bn(jax.random.fold_in(key, 0), 3, STEM_C, 7, 7)}
    stages = []
    cin = STEM_C
    idx = 1
    for nblocks, mid, cout, stride in STAGES:
        blocks = []
        for b in range(nblocks):
            s = stride if b == 0 else 1
            blocks.append(
                _init_block(jax.random.fold_in(key, idx), cin, mid, cout, CARDINALITY, s)
            )
            idx += 1
            cin = cout
        stages.append(blocks)
    params["stages"] = stages
    return params


# ----------------------------------------------------------------------------
# Forward pass (layer0 stem, layer1 = maxpool + stage1, layer2, layer3)
# ----------------------------------------------------------------------------
@jax.jit
def _stem_forward(x_nchw, stem_p):
    x = jnp.transpose(x_nchw, (0, 2, 3, 1)).astype(jnp.bfloat16)   # NCHW -> NHWC
    x = conv_bn(x, stem_p, kh=7, kw=7, stride=2, pad=3, relu=True)
    return maxpool_3x3_s2(x)


@functools.partial(jax.jit, static_argnames=("stride",))
def _block_forward(x, p, *, stride):
    y = conv_bn(x, p["conv1"], relu=True)                                    # 1x1
    y = conv_bn(y, p["conv2"], kh=3, kw=3, stride=stride, pad=1, relu=True)  # grouped 3x3
    sc = conv_bn(x, p["down"], stride=stride, relu=False) if "down" in p else x
    return conv_bn(y, p["conv3"], relu=False, residual=sc)                   # 1x1 + add + relu


def resnext101_fork_forward(x_nchw, params):
    x = _stem_forward(x_nchw, params["stem"])
    for si, (nblocks, _, _, stride) in enumerate(STAGES):
        for b in range(nblocks):
            s = stride if b == 0 else 1
            x = _block_forward(x, params["stages"][si][b], stride=s)
    # NHWC -> NCHW, back to f32 to match the PyTorch module's output.
    return jnp.transpose(x, (0, 3, 1, 2)).astype(jnp.float32)


# ----------------------------------------------------------------------------
if __name__ == "__main__":
    key = jax.random.PRNGKey(0)
    pkey, xkey = jax.random.split(key)
    params = init_params(pkey)

    # Small input consistent with the module: NCHW RGB image batch.
    x = jax.random.normal(xkey, (2, 3, 32, 32), jnp.float32)

    out = resnext101_fork_forward(x, params)
    out = jax.block_until_ready(out)

    # 32x32 -> /2 (stem) -> /2 (maxpool) -> /2 (stage2) -> /2 (stage3) = 2x2, 1024 ch
    assert out.shape == (2, 1024, 2, 2), out.shape
    assert bool(jnp.all(jnp.isfinite(out)))
    print("KERNEL_OK")
</pallas_src>

<mosaic_0001>
module attributes {stable_mosaic.version = 11 : i64} {
  func.func @_conv_bn_kernel(%arg0: i32, %arg1: memref<512x147xbf16, #tpu.memory_space<vmem>>, %arg2: memref<147x64xbf16, #tpu.memory_space<vmem>>, %arg3: memref<1x64xf32, #tpu.memory_space<vmem>>, %arg4: memref<1x64xf32, #tpu.memory_space<vmem>>, %arg5: memref<512x64xbf16, #tpu.memory_space<vmem>>) attributes {dimension_semantics = [#tpu.dimension_semantics<parallel>], iteration_bounds = array<i64: 1>, scalar_prefetch = 0 : i64, scratch_operands = 0 : i64, tpu.core_type = #tpu.core_type<tc>, window_params = [{transform_indices = @transform_0, window_bounds = array<i64: 512, 147>}, {pipeline_mode = #tpu.pipeline_mode<synchronous>, transform_indices = @transform_1, window_bounds = array<i64: 147, 64>}, {pipeline_mode = #tpu.pipeline_mode<synchronous>, transform_indices = @transform_2, window_bounds = array<i64: 1, 64>}, {pipeline_mode = #tpu.pipeline_mode<synchronous>, transform_indices = @transform_3, window_bounds = array<i64: 1, 64>}, {transform_indices = @transform_4, window_bounds = array<i64: 512, 64>}]} {
    %c0 = arith.constant 0 : index
    %c0_0 = arith.constant 0 : index
    %0 = vector.load %arg1[%c0, %c0_0] : memref<512x147xbf16, #tpu.memory_space<vmem>>, vector<512x147xbf16>
    %c0_1 = arith.constant 0 : index
    %c0_2 = arith.constant 0 : index
    %1 = vector.load %arg2[%c0_1, %c0_2] : memref<147x64xbf16, #tpu.memory_space<vmem>>, vector<147x64xbf16>
    %cst = arith.constant dense<0.000000e+00> : vector<512x64xf32>
    %2 = tpu.matmul %0, %1, %cst {dimension_numbers = #tpu.dot_dimension_numbers<[1], [0], [0], [1], [0, 0, 1, 1], [], []>} : vector<512x147xbf16>, vector<147x64xbf16>, vector<512x64xf32> -> vector<512x64xf32>
    %c0_3 = arith.constant 0 : index
    %c0_4 = arith.constant 0 : index
    %3 = vector.load %arg3[%c0_3, %c0_4] : memref<1x64xf32, #tpu.memory_space<vmem>>, vector<1x64xf32>
    %4 = vector.broadcast %3 : vector<1x64xf32> to vector<512x64xf32>
    %5 = arith.mulf %2, %4 : vector<512x64xf32>
    %c0_5 = arith.constant 0 : index
    %c0_6 = arith.constant 0 : index
    %6 = vector.load %arg4[%c0_5, %c0_6] : memref<1x64xf32, #tpu.memory_space<vmem>>, vector<1x64xf32>
    %7 = vector.broadcast %6 : vector<1x64xf32> to vector<512x64xf32>
    %8 = arith.addf %5, %7 : vector<512x64xf32>
    %cst_7 = arith.constant 0.000000e+00 : f32
    %9 = vector.broadcast %cst_7 : f32 to vector<512x64xf32>
    %10 = arith.maximumf %8, %9 : vector<512x64xf32>
    %11 = arith.truncf %10 : vector<512x64xf32> to vector<512x64xbf16>
    %c0_8 = arith.constant 0 : index
    %c0_9 = arith.constant 0 : index
    %12 = vector.load %arg5[%c0_8, %c0_9] : memref<512x64xbf16, #tpu.memory_space<vmem>>, vector<512x64xbf16>
    tpu.vector_store %arg5[%c0_8, %c0_9], %11 {strides = array<i32>} : memref<512x64xbf16, #tpu.memory_space<vmem>>, vector<512x64xbf16>,
    return
  }
  func.func @transform_0(%arg0: i32) -> (i32, i32) {
    %c0_i32 = arith.constant 0 : i32
    %c0_i32_0 = arith.constant 0 : i32
    return %arg0, %c0_i32 : i32, i32
  }
  func.func @transform_1(%arg0: i32) -> (i32, i32) {
    %c0_i32 = arith.constant 0 : i32
    %c0_i32_0 = arith.constant 0 : i32
    %c0_i32_1 = arith.constant 0 : i32
    return %c0_i32, %c0_i32_0 : i32, i32
  }
  func.func @transform_2(%arg0: i32) -> (i32, i32) {
    %c0_i32 = arith.constant 0 : i32
    %c0_i32_0 = arith.constant 0 : i32
    %c0_i32_1 = arith.constant 0 : i32
    return %c0_i32, %c0_i32_0 : i32, i32
  }
  func.func @transform_3(%arg0: i32) -> (i32, i32) {
    %c0_i32 = arith.constant 0 : i32
    %c0_i32_0 = arith.constant 0 : i32
    %c0_i32_1 = arith.constant 0 : i32
    return %c0_i32, %c0_i32_0 : i32, i32
  }
  func.func @transform_4(%arg0: i32) -> (i32, i32) {
    %c0_i32 = arith.constant 0 : i32
    %c0_i32_0 = arith.constant 0 : i32
    return %arg0, %c0_i32 : i32, i32
  }
}

module attributes {stable_mosaic.version = 11 : i64} {
  func.func @_maxpool9_kernel(%arg0: i32, %arg1: memref<128x64xbf16, #tpu.memory_space<vmem>>, %arg2: memref<128x64xbf16, #tpu.memory_space<vmem>>, %arg3: memref<128x64xbf16, #tpu.memory_space<vmem>>, %arg4: memref<128x64xbf16, #tpu.memory_space<vmem>>, %arg5: memref<128x64xbf16, #tpu.memory_space<vmem>>, %arg6: memref<128x64xbf16, #tpu.memory_space<vmem>>, %arg7: memref<128x64xbf16, #tpu.memory_space<vmem>>, %arg8: memref<128x64xbf16, #tpu.memory_space<vmem>>, %arg9: memref<128x64xbf16, #tpu.memory_space<vmem>>, %arg10: memref<128x64xbf16, #tpu.memory_space<vmem>>) attributes {dimension_semantics = [#tpu.dimension_semantics<parallel>], iteration_bounds = array<i64: 1>, scalar_prefetch = 0 : i64, scratch_operands = 0 : i64, tpu.core_type = #tpu.core_type<tc>, window_params = [{transform_indices = @transform_0, window_bounds = array<i64: 128, 64>}, {transform_indices = @transform_1, window_bounds = array<i64: 128, 64>}, {transform_indices = @transform_2, window_bounds = array<i64: 128, 64>}, {transform_indices = @transform_3, window_bounds = array<i64: 128, 64>}, {transform_indices = @transform_4, window_bounds = array<i64: 128, 64>}, {transform_indices = @transform_5, window_bounds = array<i64: 128, 64>}, {transform_indices = @transform_6, window_bounds = array<i64: 128, 64>}, {transform_indices = @transform_7, window_bounds = array<i64: 128, 64>}, {transform_indices = @transform_8, window_bounds = array<i64: 128, 64>}, {transform_indices = @transform_9, window_bounds = array<i64: 128, 64>}]} {
    %c0 = arith.constant 0 : index
    %c0_0 = arith.constant 0 : index
    %0 = vector.load %arg1[%c0, %c0_0] : memref<128x64xbf16, #tpu.memory_space<vmem>>, vector<128x64xbf16>
    %c0_1 = arith.constant 0 : index
    %c0_2 = arith.constant 0 : index
    %1 = vector.load %arg2[%c0_1, %c0_2] : memref<128x64xbf16, #tpu.memory_space<vmem>>, vector<128x64xbf16>
    %2 = arith.maximumf %0, %1 : vector<128x64xbf16>
    %c0_3 = arith.constant 0 : index
    %c0_4 = arith.constant 0 : index
    %3 = vector.load %arg3[%c0_3, %c0_4] : memref<128x64xbf16, #tpu.memory_space<vmem>>, vector<128x64xbf16>
    %4 = arith.maximumf %2, %3 : vector<128x64xbf16>
    %c0_5 = arith.constant 0 : index
    %c0_6 = arith.constant 0 : index
    %5 = vector.load %arg4[%c0_5, %c0_6] : memref<128x64xbf16, #tpu.memory_space<vmem>>, vector<128x64xbf16>
    %6 = arith.maximumf %4, %5 : vector<128x64xbf16>
    %c0_7 = arith.constant 0 : index
    %c0_8 = arith.constant 0 : index
    %7 = vector.load %arg5[%c0_7, %c0_8] : memref<128x64xbf16, #tpu.memory_space<vmem>>, vector<128x64xbf16>
    %8 = arith.maximumf %6, %7 : vector<128x64xbf16>
    %c0_9 = arith.constant 0 : index
    %c0_10 = arith.constant 0 : index
    %9 = vector.load %arg6[%c0_9, %c0_10] : memref<128x64xbf16, #tpu.memory_space<vmem>>, vector<128x64xbf16>
    %10 = arith.maximumf %8, %9 : vector<128x64xbf16>
    %c0_11 = arith.constant 0 : index
    %c0_12 = arith.constant 0 : index
    %11 = vector.load %arg7[%c0_11, %c0_12] : memref<128x64xbf16, #tpu.memory_space<vmem>>, vector<128x64xbf16>
    %12 = arith.maximumf %10, %11 : vector<128x64xbf16>
    %c0_13 = arith.constant 0 : index
    %c0_14 = arith.constant 0 : index
    %13 = vector.load %arg8[%c0_13, %c0_14] : memref<128x64xbf16, #tpu.memory_space<vmem>>, vector<128x64xbf16>
    %14 = arith.maximumf %12, %13 : vector<128x64xbf16>
    %c0_15 = arith.constant 0 : index
    %c0_16 = arith.constant 0 : index
    %15 = vector.load %arg9[%c0_15, %c0_16] : memref<128x64xbf16, #tpu.memory_space<vmem>>, vector<128x64xbf16>
    %16 = arith.maximumf %14, %15 : vector<128x64xbf16>
    %c0_17 = arith.constant 0 : index
    %c0_18 = arith.constant 0 : index
    %17 = vector.load %arg10[%c0_17, %c0_18] : memref<128x64xbf16, #tpu.memory_space<vmem>>, vector<128x64xbf16>
    tpu.vector_store %arg10[%c0_17, %c0_18], %16 {strides = array<i32>} : memref<128x64xbf16, #tpu.memory_space<vmem>>, vector<128x64xbf16>,
    return
  }
  func.func @transform_0(%arg0: i32) -> (i32, i32) {
    %c0_i32 = arith.constant 0 : i32
    %c0_i32_0 = arith.constant 0 : i32
    return %arg0, %c0_i32 : i32, i32
  }
  func.func @transform_1(%arg0: i32) -> (i32, i32) {
    %c0_i32 = arith.constant 0 : i32
    %c0_i32_0 = arith.constant 0 : i32
    return %arg0, %c0_i32 : i32, i32
  }
  func.func @transform_2(%arg0: i32) -> (i32, i32) {
    %c0_i32 = arith.constant 0 : i32
    %c0_i32_0 = arith.constant 0 : i32
    return %arg0, %c0_i32 : i32, i32
  }
  func.func @transform_3(%arg0: i32) -> (i32, i32) {
    %c0_i32 = arith.constant 0 : i32
    %c0_i32_0 = arith.constant 0 : i32
    return %arg0, %c0_i32 : i32, i32
  }
  func.func @transform_4(%arg0: i32) -> (i32, i32) {
    %c0_i32 = arith.constant 0 : i32
    %c0_i32_0 = arith.constant 0 : i32
    return %arg0, %c0_i32 : i32, i32
  }
  func.func @transform_5(%arg0: i32) -> (i32, i32) {
    %c0_i32 = arith.constant 0 : i32
    %c0_i32_0 = arith.constant 0 : i32
    return %arg0, %c0_i32 : i32, i32
  }
  func.func @transform_6(%arg0: i32) -> (i32, i32) {
    %c0_i32 = arith.constant 0 : i32
    %c0_i32_0 = arith.constant 0 : i32
    return %arg0, %c0_i32 : i32, i32
  }
  func.func @transform_7(%arg0: i32) -> (i32, i32) {
    %c0_i32 = arith.constant 0 : i32
    %c0_i32_0 = arith.constant 0 : i32
    return %arg0, %c0_i32 : i32, i32
  }
  func.func @transform_8(%arg0: i32) -> (i32, i32) {
    %c0_i32 = arith.constant 0 : i32
    %c0_i32_0 = arith.constant 0 : i32
    return %arg0, %c0_i32 : i32, i32
  }
  func.func @transform_9(%arg0: i32) -> (i32, i32) {
    %c0_i32 = arith.constant 0 : i32
    %c0_i32_0 = arith.constant 0 : i32
    return %arg0, %c0_i32 : i32, i32
  }
}

</mosaic_0001>

<bundles_post_ra>
// kernel: _stem_forward.3
= control target key start
LH: loop header
LB: loop body
LE: loop exit
PB: predicated region body
PF: predicated region fallthrough
CT: control target
= control target key end

     0   :  { %vm305_vm0 = vcmask 519168   ;;  %s878_s0 = inlined_call_operand.vmem [shape: bf16[128,64], index: 0, kind: input, shape index: {}]   ;;  %s879_s1 = inlined_call_operand.vmem [shape: bf16[128,64], index: 1, kind: input, shape index: {}]   ;;  %s880_s2 = inlined_call_operand.vmem [shape: bf16[128,64], index: 2, kind: input, shape index: {}]   ;;  %s881_s3 = inlined_call_operand.vmem [shape: bf16[128,64], index: 3, kind: input, shape index: {}]   ;;  %s882_s4 = inlined_call_operand.vmem [shape: bf16[128,64], index: 4, kind: input, shape index: {}]   ;;  %s883_s5 = inlined_call_operand.vmem [shape: bf16[128,64], index: 5, kind: input, shape index: {}]   ;;  %s884_s6 = inlined_call_operand.vmem [shape: bf16[128,64], index: 6, kind: input, shape index: {}]   ;;  %s885_s7 = inlined_call_operand.vmem [shape: bf16[128,64], index: 7, kind: input, shape index: {}]   ;;  %s886_s8 = inlined_call_operand.vmem [shape: bf16[128,64], index: 8, kind: input, shape index: {}]   ;;  %s887_s9 = inlined_call_operand.hbm [shape: bf16[128,64], index: 9, kind: output, shape index: {}]  }
   0x1   :  { %v33_v0 = vld [vmem:[%s878_s0] sm:$0xf]  ;;  %v34_v6 = vld [vmem:[%s878_s0 + $0x4] sm:$0xf]  ;;  %v35_v15 = vld [vmem:[%s878_s0 + $0x8] sm:$0xf] }
   0x2   :  { %v49_v1 = vld [vmem:[%s879_s1] sm:$0xf]  ;;  %v50_v7 = vld [vmem:[%s879_s1 + $0x4] sm:$0xf]  ;;  %v51_v16 = vld [vmem:[%s879_s1 + $0x8] sm:$0xf] }
   0x3   :  { %v81_v2 = vld [vmem:[%s880_s2] sm:$0xf]  ;;  %v65_v3 = vmax.bf16 %v49_v1, %v33_v0  ;;  %v66_v9 = vmax.bf16 %v50_v7, %v34_v6  ;;  %v82_v10 = vld [vmem:[%s880_s2 + $0x4] sm:$0xf]  ;;  %v67_v19 = vmax.bf16 %v51_v16, %v35_v15  ;;  %v83_v20 = vld [vmem:[%s880_s2 + $0x8] sm:$0xf] }
   0x4   :  { %v113_v4 = vld [vmem:[%s881_s3] sm:$0xf]  ;;  %v114_v12 = vld [vmem:[%s881_s3 + $0x4] sm:$0xf]  ;;  %v115_v24 = vld [vmem:[%s881_s3 + $0x8] sm:$0xf] }
   0x5   :  { %v97_v5 = vmax.bf16 %v81_v2, %v65_v3  ;;  %v145_v8 = vld [vmem:[%s882_s4] sm:$0xf]  ;;  %v98_v14 = vmax.bf16 %v82_v10, %v66_v9  ;;  %v146_v18 = vld [vmem:[%s882_s4 + $0x4] sm:$0xf]  ;;  %v99_v27 = vmax.bf16 %v83_v20, %v67_v19  ;;  %v36_v28 = vld [vmem:[%s878_s0 + $0xc] sm:$0xf] }
   0x6   :  { %v177_v13 = vld [vmem:[%s883_s5] sm:$0xf]  ;;  %v178_v26 = vld [vmem:[%s883_s5 + $0x4] sm:$0xf]  ;;  %v52_v29 = vld [vmem:[%s879_s1 + $0xc] sm:$0xf] }
   0x7   :  { %v129_v11 = vmax.bf16 %v113_v4, %v97_v5  ;;  %v209_v21 = vld [vmem:[%s884_s6] sm:$0xf]  ;;  %v130_v23 = vmax.bf16 %v114_v12, %v98_v14  ;;  %v147_v32 = vld [vmem:[%s882_s4 + $0x8] sm:$0xf]  ;;  %v68_v33 = vmax.bf16 %v52_v29, %v36_v28  ;;  %v84_v34 = vld [vmem:[%s880_s2 + $0xc] sm:$0xf]  ;;  %v131_v37 = vmax.bf16 %v115_v24, %v99_v27 }
   0x8   :  { %v241_v22 = vld [vmem:[%s885_s7] sm:$0xf]  ;;  %v210_v36 = vld [vmem:[%s884_s6 + $0x4] sm:$0xf]  ;;  %v116_v38 = vld [vmem:[%s881_s3 + $0xc] sm:$0xf] }
   0x9   :  { %v161_v17 = vmax.bf16 %v145_v8, %v129_v11  ;;  %v273_v30 = vld [vmem:[%s886_s8] sm:$0xf]  ;;  %v162_v31 = vmax.bf16 %v146_v18, %v130_v23  ;;  %v179_v40 = vld [vmem:[%s883_s5 + $0x8] sm:$0xf]  ;;  %v100_v41 = vmax.bf16 %v84_v34, %v68_v33  ;;  %v37_v42 = vld [vmem:[%s878_s0 + $0x10] sm:$0xf]  ;;  %v163_v46 = vmax.bf16 %v147_v32, %v131_v37 }
   0xa   :  { %v53_v43 = vld [vmem:[%s879_s1 + $0x10] sm:$0xf]  ;;  %v242_v45 = vld [vmem:[%s885_s7 + $0x4] sm:$0xf]  ;;  %v148_v47 = vld [vmem:[%s882_s4 + $0xc] sm:$0xf] }
   0xb   :  { %v193_v25 = vmax.bf16 %v177_v13, %v161_v17  ;;  %v194_v39 = vmax.bf16 %v178_v26, %v162_v31  ;;  %v69_v48 = vmax.bf16 %v53_v43, %v37_v42  ;;  %v85_v49 = vld [vmem:[%s880_s2 + $0x10] sm:$0xf]  ;;  %v274_v51 = vld [vmem:[%s886_s8 + $0x4] sm:$0xf]  ;;  %v211_v52 = vld [vmem:[%s884_s6 + $0x8] sm:$0xf]  ;;  %v132_v53 = vmax.bf16 %v116_v38, %v100_v41 }
   0xc   :  { %v117_v54 = vld [vmem:[%s881_s3 + $0x10] sm:$0xf]  ;;  %v195_v56 = vmax.bf16 %v179_v40, %v163_v46  ;;  %v180_v57 = vld [vmem:[%s883_s5 + $0xc] sm:$0xf]  ;;  %v38_v59 = vld [vmem:[%s878_s0 + $0x14] sm:$0xf] }
   0xd   :  { %v225_v35 = vmax.bf16 %v209_v21, %v193_v25  ;;  %v226_v50 = vmax.bf16 %v210_v36, %v194_v39  ;;  %v101_v58 = vmax.bf16 %v85_v49, %v69_v48  ;;  %v54_v60 = vld [vmem:[%s879_s1 + $0x14] sm:$0xf]  ;;  %v243_v62 = vld [vmem:[%s885_s7 + $0x8] sm:$0xf]  ;;  %v164_v63 = vmax.bf16 %v148_v47, %v132_v53  ;;  %v149_v0 = vld [vmem:[%s882_s4 + $0x10] sm:$0xf] }
   0xe   :  { %v70_v1 = vmax.bf16 %v54_v60, %v38_v59  ;;  %v86_v2 = vld [vmem:[%s880_s2 + $0x14] sm:$0xf]  ;;  %v227_v3 = vmax.bf16 %v211_v52, %v195_v56  ;;  %v275_v4 = vld [vmem:[%s886_s8 + $0x8] sm:$0xf]  ;;  %v212_v5 = vld [vmem:[%s884_s6 + $0xc] sm:$0xf] }
   0xf   :  { %v257_v44 = vmax.bf16 %v241_v22, %v225_v35  ;;  %v258_v61 = vmax.bf16 %v242_v45, %v226_v50  ;;  %v133_v6 = vmax.bf16 %v117_v54, %v101_v58  ;;  %v118_v7 = vld [vmem:[%s881_s3 + $0x14] sm:$0xf]  ;;  %v196_v9 = vmax.bf16 %v180_v57, %v164_v63  ;;  %v181_v10 = vld [vmem:[%s883_s5 + $0x10] sm:$0xf]  ;;  %v39_v12 = vld [vmem:[%s878_s0 + $0x18] sm:$0xf] }
  0x10   :  { %v102_v11 = vmax.bf16 %v86_v2, %v70_v1  ;;  %v55_v13 = vld [vmem:[%s879_s1 + $0x18] sm:$0xf]  ;;  %v259_v14 = vmax.bf16 %v243_v62, %v227_v3  ;;  %v244_v15 = vld [vmem:[%s885_s7 + $0xc] sm:$0xf]  ;;  %v150_v17 = vld [vmem:[%s882_s4 + $0x14] sm:$0xf] }
  0x11   :  { %v289_v55 = vmax.bf16 %v273_v30, %v257_v44  ;;  %v290_v8 = vmax.bf16 %v274_v51, %v258_v61  ;;  %v165_v16 = vmax.bf16 %v149_v0, %v133_v6  ;;  %v71_v18 = vmax.bf16 %v55_v13, %v39_v12  ;;  %v87_v19 = vld [vmem:[%s880_s2 + $0x18] sm:$0xf]  ;;  %v276_v21 = vld [vmem:[%s886_s8 + $0xc] sm:$0xf]  ;;  %v213_v22 = vld [vmem:[%s884_s6 + $0x10] sm:$0xf] }
  0x12   :  { %v228_v20 = vmax.bf16 %v212_v5, %v196_v9  ;;  %v134_v23 = vmax.bf16 %v118_v7, %v102_v11  ;;  %v119_v24 = vld [vmem:[%s881_s3 + $0x18] sm:$0xf]  ;;  %v291_v25 = vmax.bf16 %v275_v4, %v259_v14  ;;  %v182_v27 = vld [vmem:[%s883_s5 + $0x14] sm:$0xf]  ;;  %v40_v29 = vld [vmem:[%s878_s0 + $0x1c] sm:$0xf] }
  0x13   :  { %306 = vst.msk [vmem:[#allocation2] sm:$0xf] %vm305_vm0, %v289_v55  ;;  %307 = vst.msk [vmem:[#allocation2 + $0x4] sm:$0xf] %vm305_vm0, %v290_v8  ;;  %v197_v26 = vmax.bf16 %v181_v10, %v165_v16  ;;  %v103_v28 = vmax.bf16 %v87_v19, %v71_v18  ;;  %v56_v30 = vld [vmem:[%s879_s1 + $0x1c] sm:$0xf] }
  0x14   :  { %v260_v31 = vmax.bf16 %v244_v15, %v228_v20  ;;  %v245_v32 = vld [vmem:[%s885_s7 + $0x10] sm:$0xf]  ;;  %v166_v33 = vmax.bf16 %v150_v17, %v134_v23  ;;  %v151_v34 = vld [vmem:[%s882_s4 + $0x18] sm:$0xf]  ;;  %v72_v35 = vmax.bf16 %v56_v30, %v40_v29  ;;  %v88_v36 = vld [vmem:[%s880_s2 + $0x1c] sm:$0xf] }
  0x15   :  { %308 = vst.msk [vmem:[#allocation2 + $0x8] sm:$0xf] %vm305_vm0, %v291_v25  ;;  %v229_v37 = vmax.bf16 %v213_v22, %v197_v26  ;;  %v277_v38 = vld [vmem:[%s886_s8 + $0x10] sm:$0xf]  ;;  %v214_v39 = vld [vmem:[%s884_s6 + $0x14] sm:$0xf]  ;;  %v135_v40 = vmax.bf16 %v119_v24, %v103_v28 }
  0x16   :  { %v120_v41 = vld [vmem:[%s881_s3 + $0x1c] sm:$0xf]  ;;  %v292_v42 = vmax.bf16 %v276_v21, %v260_v31  ;;  %v198_v43 = vmax.bf16 %v182_v27, %v166_v33  ;;  %v183_v44 = vld [vmem:[%s883_s5 + $0x18] sm:$0xf]  ;;  %v104_v45 = vmax.bf16 %v88_v36, %v72_v35  ;;  %v41_v46 = vld [vmem:[%s878_s0 + $0x20] sm:$0xf] }
  0x17   :  { %v57_v47 = vld [vmem:[%s879_s1 + $0x20] sm:$0xf]  ;;  %v261_v48 = vmax.bf16 %v245_v32, %v229_v37  ;;  %v246_v49 = vld [vmem:[%s885_s7 + $0x14] sm:$0xf]  ;;  %v167_v50 = vmax.bf16 %v151_v34, %v135_v40  ;;  %v152_v51 = vld [vmem:[%s882_s4 + $0x1c] sm:$0xf] }
  0x18   :  { %v73_v52 = vmax.bf16 %v57_v47, %v41_v46  ;;  %v89_v53 = vld [vmem:[%s880_s2 + $0x20] sm:$0xf]  ;;  %309 = vst.msk [vmem:[#allocation2 + $0xc] sm:$0xf] %vm305_vm0, %v292_v42  ;;  %v230_v54 = vmax.bf16 %v214_v39, %v198_v43  ;;  %v278_v55 = vld [vmem:[%s886_s8 + $0x14] sm:$0xf]  ;;  %v136_v57 = vmax.bf16 %v120_v41, %v104_v45 }
  0x19   :  { %v215_v56 = vld [vmem:[%s884_s6 + $0x18] sm:$0xf]  ;;  %v121_v58 = vld [vmem:[%s881_s3 + $0x20] sm:$0xf]  ;;  %v293_v59 = vmax.bf16 %v277_v38, %v261_v48  ;;  %v199_v60 = vmax.bf16 %v183_v44, %v167_v50  ;;  %v184_v61 = vld [vmem:[%s883_s5 + $0x1c] sm:$0xf] }
  0x1a   :  { %v105_v62 = vmax.bf16 %v89_v53, %v73_v52  ;;  %v42_v63 = vld [vmem:[%s878_s0 + $0x24] sm:$0xf]  ;;  %v262_v1 = vmax.bf16 %v246_v49, %v230_v54  ;;  %v247_v2 = vld [vmem:[%s885_s7 + $0x18] sm:$0xf]  ;;  %v168_v3 = vmax.bf16 %v152_v51, %v136_v57  ;;  %v153_v4 = vld [vmem:[%s882_s4 + $0x20] sm:$0xf] }
  0x1b   :  { %v58_v0 = vld [vmem:[%s879_s1 + $0x24] sm:$0xf]  ;;  %310 = vst.msk [vmem:[#allocation2 + $0x10] sm:$0xf] %vm305_vm0, %v293_v59  ;;  %v231_v7 = vmax.bf16 %v215_v56, %v199_v60  ;;  %v279_v8 = vld [vmem:[%s886_s8 + $0x18] sm:$0xf] }
  0x1c   :  { %v74_v5 = vmax.bf16 %v58_v0, %v42_v63  ;;  %v90_v6 = vld [vmem:[%s880_s2 + $0x24] sm:$0xf]  ;;  %v216_v9 = vld [vmem:[%s884_s6 + $0x1c] sm:$0xf]  ;;  %v137_v10 = vmax.bf16 %v121_v58, %v105_v62  ;;  %v294_v12 = vmax.bf16 %v278_v55, %v262_v1  ;;  %v200_v13 = vmax.bf16 %v184_v61, %v168_v3  ;;  %v185_v14 = vld [vmem:[%s883_s5 + $0x20] sm:$0xf] }
  0x1d   :  { %v122_v11 = vld [vmem:[%s881_s3 + $0x24] sm:$0xf]  ;;  %v43_v16 = vld [vmem:[%s878_s0 + $0x28] sm:$0xf]  ;;  %v263_v18 = vmax.bf16 %v247_v2, %v231_v7  ;;  %v248_v19 = vld [vmem:[%s885_s7 + $0x1c] sm:$0xf] }
  0x1e   :  { %v106_v15 = vmax.bf16 %v90_v6, %v74_v5  ;;  %v59_v17 = vld [vmem:[%s879_s1 + $0x28] sm:$0xf]  ;;  %v169_v20 = vmax.bf16 %v153_v4, %v137_v10  ;;  %v154_v21 = vld [vmem:[%s882_s4 + $0x24] sm:$0xf]  ;;  %311 = vst.msk [vmem:[#allocation2 + $0x14] sm:$0xf] %vm305_vm0, %v294_v12  ;;  %v232_v24 = vmax.bf16 %v216_v9, %v200_v13 }
  0x1f   :  { %v75_v22 = vmax.bf16 %v59_v17, %v43_v16  ;;  %v91_v23 = vld [vmem:[%s880_s2 + $0x28] sm:$0xf]  ;;  %v280_v25 = vld [vmem:[%s886_s8 + $0x1c] sm:$0xf]  ;;  %v217_v26 = vld [vmem:[%s884_s6 + $0x20] sm:$0xf]  ;;  %v295_v29 = vmax.bf16 %v279_v8, %v263_v18 }
  0x20   :  { %v138_v27 = vmax.bf16 %v122_v11, %v106_v15  ;;  %v123_v28 = vld [vmem:[%s881_s3 + $0x28] sm:$0xf]  ;;  %v201_v30 = vmax.bf16 %v185_v14, %v169_v20  ;;  %v186_v31 = vld [vmem:[%s883_s5 + $0x24] sm:$0xf]  ;;  %v44_v33 = vld [vmem:[%s878_s0 + $0x2c] sm:$0xf]  ;;  %v264_v35 = vmax.bf16 %v248_v19, %v232_v24 }
  0x21   :  { %v107_v32 = vmax.bf16 %v91_v23, %v75_v22  ;;  %v60_v34 = vld [vmem:[%s879_s1 + $0x2c] sm:$0xf]  ;;  %v249_v36 = vld [vmem:[%s885_s7 + $0x20] sm:$0xf]  ;;  %v155_v38 = vld [vmem:[%s882_s4 + $0x28] sm:$0xf] }
  0x22   :  { %v170_v37 = vmax.bf16 %v154_v21, %v138_v27  ;;  %v76_v39 = vmax.bf16 %v60_v34, %v44_v33  ;;  %v92_v40 = vld [vmem:[%s880_s2 + $0x2c] sm:$0xf]  ;;  %312 = vst.msk [vmem:[#allocation2 + $0x18] sm:$0xf] %vm305_vm0, %v295_v29  ;;  %v233_v41 = vmax.bf16 %v217_v26, %v201_v30  ;;  %v281_v42 = vld [vmem:[%s886_s8 + $0x20] sm:$0xf]  ;;  %v296_v46 = vmax.bf16 %v280_v25, %v264_v35 }
  0x23   :  { %v218_v43 = vld [vmem:[%s884_s6 + $0x24] sm:$0xf]  ;;  %v139_v44 = vmax.bf16 %v123_v28, %v107_v32  ;;  %v124_v45 = vld [vmem:[%s881_s3 + $0x2c] sm:$0xf]  ;;  %v187_v48 = vld [vmem:[%s883_s5 + $0x28] sm:$0xf] }
  0x24   :  { %v202_v47 = vmax.bf16 %v186_v31, %v170_v37  ;;  %v108_v49 = vmax.bf16 %v92_v40, %v76_v39  ;;  %v45_v50 = vld [vmem:[%s878_s0 + $0x30] sm:$0xf]  ;;  %v265_v52 = vmax.bf16 %v249_v36, %v233_v41  ;;  %v250_v53 = vld [vmem:[%s885_s7 + $0x24] sm:$0xf]  ;;  %v156_v55 = vld [vmem:[%s882_s4 + $0x2c] sm:$0xf] }
  0x25   :  { %v61_v51 = vld [vmem:[%s879_s1 + $0x30] sm:$0xf]  ;;  %v171_v54 = vmax.bf16 %v155_v38, %v139_v44  ;;  %313 = vst.msk [vmem:[#allocation2 + $0x1c] sm:$0xf] %vm305_vm0, %v296_v46  ;;  %v282_v59 = vld [vmem:[%s886_s8 + $0x24] sm:$0xf] }
  0x26   :  { %v77_v56 = vmax.bf16 %v61_v51, %v45_v50  ;;  %v93_v57 = vld [vmem:[%s880_s2 + $0x30] sm:$0xf]  ;;  %v234_v58 = vmax.bf16 %v218_v43, %v202_v47  ;;  %v219_v60 = vld [vmem:[%s884_s6 + $0x28] sm:$0xf]  ;;  %v140_v61 = vmax.bf16 %v124_v45, %v108_v49  ;;  %v297_v63 = vmax.bf16 %v281_v42, %v265_v52  ;;  %v188_v1 = vld [vmem:[%s883_s5 + $0x2c] sm:$0xf] }
  0x27   :  { %v125_v62 = vld [vmem:[%s881_s3 + $0x30] sm:$0xf]  ;;  %v203_v0 = vmax.bf16 %v187_v48, %v171_v54  ;;  %v46_v3 = vld [vmem:[%s878_s0 + $0x34] sm:$0xf]  ;;  %v251_v6 = vld [vmem:[%s885_s7 + $0x28] sm:$0xf] }
  0x28   :  { %v109_v2 = vmax.bf16 %v93_v57, %v77_v56  ;;  %v62_v4 = vld [vmem:[%s879_s1 + $0x34] sm:$0xf]  ;;  %v266_v5 = vmax.bf16 %v250_v53, %v234_v58  ;;  %v172_v7 = vmax.bf16 %v156_v55, %v140_v61  ;;  %v157_v8 = vld [vmem:[%s882_s4 + $0x30] sm:$0xf]  ;;  %314 = vst.msk [vmem:[#allocation2 + $0x20] sm:$0xf] %vm305_vm0, %v297_v63 }
  0x29   :  { %v78_v9 = vmax.bf16 %v62_v4, %v46_v3  ;;  %v94_v10 = vld [vmem:[%s880_s2 + $0x34] sm:$0xf]  ;;  %v235_v11 = vmax.bf16 %v219_v60, %v203_v0  ;;  %v283_v12 = vld [vmem:[%s886_s8 + $0x28] sm:$0xf]  ;;  %v220_v13 = vld [vmem:[%s884_s6 + $0x2c] sm:$0xf] }
  0x2a   :  { %v141_v14 = vmax.bf16 %v125_v62, %v109_v2  ;;  %v126_v15 = vld [vmem:[%s881_s3 + $0x34] sm:$0xf]  ;;  %v298_v16 = vmax.bf16 %v282_v59, %v266_v5  ;;  %v204_v17 = vmax.bf16 %v188_v1, %v172_v7  ;;  %v189_v18 = vld [vmem:[%s883_s5 + $0x30] sm:$0xf]  ;;  %v47_v20 = vld [vmem:[%s878_s0 + $0x38] sm:$0xf] }
  0x2b   :  { %v110_v19 = vmax.bf16 %v94_v10, %v78_v9  ;;  %v63_v21 = vld [vmem:[%s879_s1 + $0x38] sm:$0xf]  ;;  %v267_v22 = vmax.bf16 %v251_v6, %v235_v11  ;;  %v252_v23 = vld [vmem:[%s885_s7 + $0x2c] sm:$0xf]  ;;  %v158_v25 = vld [vmem:[%s882_s4 + $0x34] sm:$0xf] }
  0x2c   :  { %v173_v24 = vmax.bf16 %v157_v8, %v141_v14  ;;  %v79_v26 = vmax.bf16 %v63_v21, %v47_v20  ;;  %v95_v27 = vld [vmem:[%s880_s2 + $0x38] sm:$0xf]  ;;  %315 = vst.msk [vmem:[#allocation2 + $0x24] sm:$0xf] %vm305_vm0, %v298_v16  ;;  %v236_v28 = vmax.bf16 %v220_v13, %v204_v17  ;;  %v284_v29 = vld [vmem:[%s886_s8 + $0x2c] sm:$0xf] }
  0x2d   :  { %v221_v30 = vld [vmem:[%s884_s6 + $0x30] sm:$0xf]  ;;  %v142_v31 = vmax.bf16 %v126_v15, %v110_v19  ;;  %v127_v32 = vld [vmem:[%s881_s3 + $0x38] sm:$0xf]  ;;  %v299_v33 = vmax.bf16 %v283_v12, %v267_v22  ;;  %v190_v35 = vld [vmem:[%s883_s5 + $0x34] sm:$0xf] }
  0x2e   :  { %v205_v34 = vmax.bf16 %v189_v18, %v173_v24  ;;  %v111_v36 = vmax.bf16 %v95_v27, %v79_v26  ;;  %v48_v37 = vld [vmem:[%s878_s0 + $0x3c] sm:$0xf]  ;;  %v268_v39 = vmax.bf16 %v252_v23, %v236_v28  ;;  %v253_v40 = vld [vmem:[%s885_s7 + $0x30] sm:$0xf]  ;;  %v159_v42 = vld [vmem:[%s882_s4 + $0x38] sm:$0xf] }
  0x2f   :  { %v64_v38 = vld [vmem:[%s879_s1 + $0x3c] sm:$0xf]  ;;  %v174_v41 = vmax.bf16 %v158_v25, %v142_v31  ;;  %316 = vst.msk [vmem:[#allocation2 + $0x28] sm:$0xf] %vm305_vm0, %v299_v33  ;;  %v222_v46 = vld [vmem:[%s884_s6 + $0x34] sm:$0xf] }
  0x30   :  { %v80_v43 = vmax.bf16 %v64_v38, %v48_v37  ;;  %v96_v44 = vld [vmem:[%s880_s2 + $0x3c] sm:$0xf]  ;;  %v237_v45 = vmax.bf16 %v221_v30, %v205_v34  ;;  %v143_v47 = vmax.bf16 %v127_v32, %v111_v36  ;;  %v300_v49 = vmax.bf16 %v284_v29, %v268_v39  ;;  %v285_v50 = vld [vmem:[%s886_s8 + $0x30] sm:$0xf]  ;;  %v191_v52 = vld [vmem:[%s883_s5 + $0x38] sm:$0xf] }
  0x31   :  { %v128_v48 = vld [vmem:[%s881_s3 + $0x3c] sm:$0xf]  ;;  %v206_v51 = vmax.bf16 %v190_v35, %v174_v41 }
  0x32   :  { %v112_v53 = vmax.bf16 %v96_v44, %v80_v43 }
  0x33   :  { %14 = vsyncpa [#allocation3], 0  ;;  %v269_v54 = vmax.bf16 %v253_v40, %v237_v45  ;;  %v254_v55 = vld [vmem:[%s885_s7 + $0x34] sm:$0xf]  ;;  %v175_v56 = vmax.bf16 %v159_v42, %v143_v47  ;;  %v160_v57 = vld [vmem:[%s882_s4 + $0x3c] sm:$0xf]  ;;  %v238_v58 = vmax.bf16 %v222_v46, %v206_v51 }
  0x34   :  { %317 = vst.msk [vmem:[#allocation2 + $0x2c] sm:$0xf] %vm305_vm0, %v300_v49  ;;  %v223_v59 = vld [vmem:[%s884_s6 + $0x38] sm:$0xf]  ;;  %v144_v60 = vmax.bf16 %v128_v48, %v112_v53  ;;  %v286_v62 = vld [vmem:[%s886_s8 + $0x34] sm:$0xf] }
  0x35   :  { %v301_v61 = vmax.bf16 %v285_v50, %v269_v54  ;;  %v207_v63 = vmax.bf16 %v191_v52, %v175_v56  ;;  %v192_v0 = vld [vmem:[%s883_s5 + $0x3c] sm:$0xf]  ;;  %v270_v1 = vmax.bf16 %v254_v55, %v238_v58  ;;  %v255_v2 = vld [vmem:[%s885_s7 + $0x38] sm:$0xf] }
  0x36   :  { %v176_v3 = vmax.bf16 %v160_v57, %v144_v60  ;;  %v224_v5 = vld [vmem:[%s884_s6 + $0x3c] sm:$0xf]  ;;  %v287_v7 = vld [vmem:[%s886_s8 + $0x38] sm:$0xf]  ;;  %s365_s6 = smov [#allocation2]  }
  0x37   :  { %318 = vst.msk [vmem:[#allocation2 + $0x30] sm:$0xf] %vm305_vm0, %v301_v61  ;;  %v239_v4 = vmax.bf16 %v223_v59, %v207_v63  ;;  %v302_v6 = vmax.bf16 %v286_v62, %v270_v1  ;;  %v256_v10 = vld [vmem:[%s885_s7 + $0x3c] sm:$0xf]  ;;  %s327_s1 = sshll.u32 %s365_s6, 4  ;;  %s328_s1 = int_to_ptr.vmem [resolvable:$true] %s327_s1 }
  0x38   :  { %v208_v8 = vmax.bf16 %v192_v0, %v176_v3  ;;  %v288_v13 = vld [vmem:[%s886_s8 + $0x3c] sm:$0xf]  ;;  %s341_s17 = scalar_lea.vmem %s328_s1, 1024  ;;  %p346_p1 = scmp.lt.s32.totalorder %s328_s1, %s328_s1 }
  0x39   :  { %v271_v9 = vmax.bf16 %v255_v2, %v239_v4  ;;  %319 = vst.msk [vmem:[#allocation2 + $0x34] sm:$0xf] %vm305_vm0, %v302_v6  ;;  %p342_p0 = scmp.ne.s32.totalorder %s328_s1, %s341_s17  ;;  %p347_p2 = scmp.lt.s32.totalorder %s341_s17, %s341_s17 }
  0x3a   :  { %v240_v11 = vmax.bf16 %v224_v5, %v208_v8 }
  0x3b   :  { %v303_v12 = vmax.bf16 %v287_v7, %v271_v9  ;;  %p348_p3 = por %p347_p2, %p346_p1 }
  0x3c   :  { %v272_v14 = vmax.bf16 %v256_v10, %v240_v11 }
  0x3d   :  { %320 = vst.msk [vmem:[#allocation2 + $0x38] sm:$0xf] %vm305_vm0, %v303_v12  ;;  %p349_p4 = pnand %p348_p3, %p342_p0 }
  0x3e   :  { %v304_v15 = vmax.bf16 %v288_v13, %v272_v14 }
  0x40   :  { %321 = vst.msk [vmem:[#allocation2 + $0x3c] sm:$0xf] %vm305_vm0, %v304_v15 }
  0x41   :  { %352 = shalt.err (!%p349_p4)
}
  0x42   :  { %s353_s8 = scalar_lea.hbm %s887_s9, 1024 }
  0x43   :  { %p354_p5 = scmp.ne.s32.totalorder %s887_s9, %s353_s8  ;;  %p357_p6 = scmp.lt.u32.totalorder %s353_s8, %s887_s9 }
  0x45   :  { %p359_p7 = pnand %p357_p6, %p354_p5 }
  0x47   :  { %362 = shalt.err (!%p359_p7)
}
  0x48   :  { %s366_s22 = smov 64   ;;  %s367_s23 = smov 4  }
  0x49   :  { %333 = dma.vmem_to_hbm [thread:$0]  %s328_s1, 1024, %s887_s9, [#allocation3], %s366_s22, %s366_s22, %s367_s23  }
  0x4a   :  { %363 = dma.done.wait [#allocation3], 1024  }
  0x4b   :  { %364 = vsyncadd [#allocation3], 4294966272 }
  0x4c   :  { %337 = vsyncpa [#allocation3], 1 }

// kernel: _stem_forward.2
= control target key start
LH: loop header
LB: loop body
LE: loop exit
PB: predicated region body
PF: predicated region fallthrough
CT: control target
= control target key end

     0   :  { %v1734_v0 = vmov 0   ;;  %vm446_vm0 = vcmask 154624   ;;  %vm543_vm1 = vcmask 1040384   ;;  %vm544_vm2 = vcmask 1041408   ;;  %s2409_s1 = inlined_call_operand.vmem [shape: bf16[147,64], index: 1, kind: input, shape index: {}]   ;;  %s2410_s0 = inlined_call_operand.vmem [shape: bf16[512,147], index: 0, kind: input, shape index: {}]   ;;  %s2411_s2 = inlined_call_operand.vmem [shape: f32[1,64], index: 2, kind: input, shape index: {}]   ;;  %s2412_s3 = inlined_call_operand.vmem [shape: f32[1,64], index: 3, kind: input, shape index: {}]   ;;  %s2413_s4 = inlined_call_operand.vmem [shape: bf16[512,64], index: 4, kind: output, shape index: {}]  }
   0x1   :  { %550 = vmatprep.subr.bf16.mxu0 %v1734_v0  ;;  %1606 = vmatprep.subr.bf16.mxu1 %v1734_v0  ;;  %v1628_v1 = vld [vmem:[%s2409_s1] sm:$0xff]   ;;  %v1629_v2 = vld [vmem:[%s2409_s1 + $0x8] sm:$0xff]   ;;  %v1630_v3 = vld [vmem:[%s2409_s1 + $0x10] sm:$0xff]   ;;  %v1735_v11 = vmov 65535   ;;  %vm1301_vm3 = vcmask 519168  }
   0x2   :  { %551 = vmatpush1.bf16.msra.mxu0 %v1628_v1  ;;  %1616 = vmatpush1.bf16.msra.mxu1 %v1628_v1  ;;  %v1631_v4 = vld [vmem:[%s2409_s1 + $0x18] sm:$0xff]   ;;  %v1640_v5 = vld [vmem:[%s2410_s0 + $0x4] ss:$8 sps:$4 sm:$0xff]   ;;  %v1634_v9 = vld [vmem:[%s2409_s1 + $0x30] sm:$0xff]   ;;  %v545_v12 = vsel %vm543_vm1, 4294967295, %v1735_v11 }
   0x3   :  { %552 = vmatprep.subr.bf16.mxu0 %v1734_v0  ;;  %1607 = vmatprep.subr.bf16.mxu1 %v1734_v0  ;;  %v1643_v6 = vld [vmem:[%s2410_s0 + $0x104] ss:$8 sps:$4 sm:$0xff]   ;;  %v1635_v10 = vld [vmem:[%s2409_s1 + $0x38] sm:$0xff]   ;;  %v1637_v14 = vld [vmem:[%s2409_s1 + $0x48] ss:$0 sps:$4 sm:$0x33]  }
   0x4   :  { %1444 = vmatprep.mubr.msk.bf16.mxu0 %vm446_vm0, %v1640_v5  ;;  %v1632_v7 = vld [vmem:[%s2409_s1 + $0x20] sm:$0xff]   ;;  %1460 = vmatprep.mubr.msk.bf16.mxu1 %vm446_vm0, %v1643_v6  ;;  %v1633_v8 = vld [vmem:[%s2409_s1 + $0x28] sm:$0xff]   ;;  %v546_v15 = vsel %vm544_vm2, %v545_v12, 0  ;;  %v1644_v19 = vld [vmem:[%s2410_s0 + $0x14] ss:$8 sps:$4 sm:$0xff]  }
   0x5   :  { %v1636_v13 = vld [vmem:[%s2409_s1 + $0x40] sm:$0xff]   ;;  %v548_v16 = vand.u32 %v1637_v14, %v546_v15  ;;  %v1646_v20 = vld [vmem:[%s2410_s0 + $0x114] ss:$8 sps:$4 sm:$0xff]   ;;  %v1648_v21 = vld [vmem:[%s2410_s0 + $0x10] ss:$8 sps:$4 sm:$0xff]  }
   0x6   :  { %553 = vmatpush1.bf16.msra.mxu0 %v1629_v2  ;;  %1617 = vmatpush1.bf16.msra.mxu1 %v1629_v2  ;;  %v1638_v17 = vld [vmem:[%s2410_s0] ss:$8 sps:$4 sm:$0xff]   ;;  %v1649_v22 = vld [vmem:[%s2410_s0 + $0x110] ss:$8 sps:$4 sm:$0xff]   ;;  %v1650_v23 = vld [vmem:[%s2410_s0 + $0x24] ss:$8 sps:$4 sm:$0xff]  }
   0x7   :  { %554 = vmatprep.subr.bf16.mxu0 %v1734_v0  ;;  %1608 = vmatprep.subr.bf16.mxu1 %v1734_v0  ;;  %v1641_v18 = vld [vmem:[%s2410_s0 + $0x100] ss:$8 sps:$4 sm:$0xff]   ;;  %v1652_v24 = vld [vmem:[%s2410_s0 + $0x124] ss:$8 sps:$4 sm:$0xff]   ;;  %v1656_v27 = vld [vmem:[%s2410_s0 + $0x34] ss:$8 sps:$4 sm:$0xff]  }
   0x8   :  { %v1654_v25 = vld [vmem:[%s2410_s0 + $0x20] ss:$8 sps:$4 sm:$0xff]   ;;  %v1658_v28 = vld [vmem:[%s2410_s0 + $0x134] ss:$8 sps:$4 sm:$0xff]   ;;  %v1660_v29 = vld [vmem:[%s2410_s0 + $0x30] ss:$8 sps:$4 sm:$0xff]  }
   0x9   :  { %v1655_v26 = vld [vmem:[%s2410_s0 + $0x120] ss:$8 sps:$4 sm:$0xff]   ;;  %v1661_v30 = vld [vmem:[%s2410_s0 + $0x130] ss:$8 sps:$4 sm:$0xff]   ;;  %v1662_v31 = vld [vmem:[%s2410_s0 + $0x44] ss:$8 sps:$4 sm:$0xff]  }
   0xa   :  { %555 = vmatpush1.bf16.msra.mxu0 %v1630_v3  ;;  %1618 = vmatpush1.bf16.msra.mxu1 %v1630_v3  ;;  %v1664_v32 = vld [vmem:[%s2410_s0 + $0x144] ss:$8 sps:$4 sm:$0xff]   ;;  %v1666_v33 = vld [vmem:[%s2410_s0 + $0x40] ss:$8 sps:$4 sm:$0xff]   ;;  %v1668_v35 = vld [vmem:[%s2410_s0 + $0x54] ss:$8 sps:$4 sm:$0xff]  }
   0xb   :  { %556 = vmatprep.subr.bf16.mxu0 %v1734_v0  ;;  %1609 = vmatprep.subr.bf16.mxu1 %v1734_v0  ;;  %v1667_v34 = vld [vmem:[%s2410_s0 + $0x140] ss:$8 sps:$4 sm:$0xff]   ;;  %v1670_v36 = vld [vmem:[%s2410_s0 + $0x154] ss:$8 sps:$4 sm:$0xff]   ;;  %v1672_v37 = vld [vmem:[%s2410_s0 + $0x50] ss:$8 sps:$4 sm:$0xff]  }
   0xc   :  { %v1673_v38 = vld [vmem:[%s2410_s0 + $0x150] ss:$8 sps:$4 sm:$0xff]   ;;  %v1674_v39 = vld [vmem:[%s2410_s0 + $0x64] ss:$8 sps:$4 sm:$0xff]   ;;  %v1678_v41 = vld [vmem:[%s2410_s0 + $0x60] ss:$8 sps:$4 sm:$0xff]  }
   0xd   :  { %v1676_v40 = vld [vmem:[%s2410_s0 + $0x164] ss:$8 sps:$4 sm:$0xff]   ;;  %v1679_v42 = vld [vmem:[%s2410_s0 + $0x160] ss:$8 sps:$4 sm:$0xff]   ;;  %v1680_v43 = vld [vmem:[%s2410_s0 + $0x74] ss:$8 sps:$4 sm:$0xff]  }
   0xe   :  { %557 = vmatpush1.bf16.msra.mxu0 %v1631_v4  ;;  %1619 = vmatpush1.bf16.msra.mxu1 %v1631_v4  ;;  %v1682_v44 = vld [vmem:[%s2410_s0 + $0x174] ss:$8 sps:$4 sm:$0xff]   ;;  %v1684_v45 = vld [vmem:[%s2410_s0 + $0x70] ss:$8 sps:$4 sm:$0xff]   ;;  %v1686_v47 = vld [vmem:[%s2410_s0 + $0x84] ss:$8 sps:$4 sm:$0xff]  }
   0xf   :  { %558 = vmatprep.subr.bf16.mxu0 %v1734_v0  ;;  %1610 = vmatprep.subr.bf16.mxu1 %v1734_v0  ;;  %v1685_v46 = vld [vmem:[%s2410_s0 + $0x170] ss:$8 sps:$4 sm:$0xff]   ;;  %v1688_v48 = vld [vmem:[%s2410_s0 + $0x184] ss:$8 sps:$4 sm:$0xff]   ;;  %v1690_v49 = vld [vmem:[%s2410_s0 + $0x80] ss:$8 sps:$4 sm:$0xff]  }
  0x10   :  { %v1691_v50 = vld [vmem:[%s2410_s0 + $0x180] ss:$8 sps:$4 sm:$0xff]   ;;  %v1692_v51 = vld [vmem:[%s2410_s0 + $0x94] ss:$8 sps:$4 sm:$0xff]   ;;  %v1696_v53 = vld [vmem:[%s2410_s0 + $0x90] ss:$8 sps:$4 sm:$0xff]  }
  0x11   :  { %v1694_v52 = vld [vmem:[%s2410_s0 + $0x194] ss:$8 sps:$4 sm:$0xff]   ;;  %v1697_v54 = vld [vmem:[%s2410_s0 + $0x190] ss:$8 sps:$4 sm:$0xff]   ;;  %v1698_v55 = vld [vmem:[%s2410_s0 + $0xa4] ss:$8 sps:$4 sm:$0xff]  }
  0x12   :  { %559 = vmatpush1.bf16.msra.mxu0 %v1632_v7  ;;  %1620 = vmatpush1.bf16.msra.mxu1 %v1632_v7  ;;  %v1700_v56 = vld [vmem:[%s2410_s0 + $0x1a4] ss:$8 sps:$4 sm:$0xff]   ;;  %v1702_v57 = vld [vmem:[%s2410_s0 + $0xa0] ss:$8 sps:$4 sm:$0xff]   ;;  %v1704_v59 = vld [vmem:[%s2410_s0 + $0xb4] ss:$8 sps:$4 sm:$0xff]  }
  0x13   :  { %560 = vmatprep.subr.bf16.mxu0 %v1734_v0  ;;  %1611 = vmatprep.subr.bf16.mxu1 %v1734_v0  ;;  %v1703_v58 = vld [vmem:[%s2410_s0 + $0x1a0] ss:$8 sps:$4 sm:$0xff]   ;;  %v1706_v60 = vld [vmem:[%s2410_s0 + $0x1b4] ss:$8 sps:$4 sm:$0xff]   ;;  %v1708_v61 = vld [vmem:[%s2410_s0 + $0xb0] ss:$8 sps:$4 sm:$0xff]  }
  0x14   :  { %v1709_v62 = vld [vmem:[%s2410_s0 + $0x1b0] ss:$8 sps:$4 sm:$0xff]   ;;  %v1710_v63 = vld [vmem:[%s2410_s0 + $0xc4] ss:$8 sps:$4 sm:$0xff]   ;;  %v1714_v1 = vld [vmem:[%s2410_s0 + $0xc0] ss:$8 sps:$4 sm:$0xff]  }
  0x15   :  { %v1715_v2 = vld [vmem:[%s2410_s0 + $0x1c0] ss:$8 sps:$4 sm:$0xff]   ;;  %v1716_v3 = vld [vmem:[%s2410_s0 + $0xd4] ss:$8 sps:$4 sm:$0xff]   ;;  %v1720_v5 = vld [vmem:[%s2410_s0 + $0xd0] ss:$8 sps:$4 sm:$0xff]  }
  0x16   :  { %561 = vmatpush1.bf16.msra.mxu0 %v1633_v8  ;;  %1621 = vmatpush1.bf16.msra.mxu1 %v1633_v8  ;;  %v1718_v4 = vld [vmem:[%s2410_s0 + $0x1d4] ss:$8 sps:$4 sm:$0xff]   ;;  %v1721_v6 = vld [vmem:[%s2410_s0 + $0x1d0] ss:$8 sps:$4 sm:$0xff]   ;;  %v1722_v7 = vld [vmem:[%s2410_s0 + $0xe4] ss:$8 sps:$4 sm:$0xff]  }
  0x17   :  { %562 = vmatprep.subr.bf16.mxu0 %v1734_v0  ;;  %1612 = vmatprep.subr.bf16.mxu1 %v1734_v0  ;;  %v1724_v8 = vld [vmem:[%s2410_s0 + $0x1e4] ss:$8 sps:$4 sm:$0xff]   ;;  %v1728_v11 = vld [vmem:[%s2410_s0 + $0xf4] ss:$8 sps:$4 sm:$0xff]   ;;  %v1733_v14 = vld [vmem:[%s2410_s0 + $0x1f0] ss:$8 sps:$4 sm:$0xff]  }
  0x18   :  { %v1730_v12 = vld [vmem:[%s2410_s0 + $0x1f4] ss:$8 sps:$4 sm:$0xff]   ;;  %v2018_v15 = vld [vmem:[%s2411_s2] ss:$0 sm:$0xff] }
  0x1a   :  { %563 = vmatpush1.bf16.msra.mxu0 %v1634_v9  ;;  %1622 = vmatpush1.bf16.msra.mxu1 %v1634_v9  ;;  %v1726_v9 = vld [vmem:[%s2410_s0 + $0xe0] ss:$8 sps:$4 sm:$0xff]  }
  0x1b   :  { %564 = vmatprep.subr.bf16.mxu0 %v1734_v0  ;;  %1613 = vmatprep.subr.bf16.mxu1 %v1734_v0 }
  0x1e   :  { %565 = vmatpush1.bf16.msra.mxu0 %v1635_v10  ;;  %1623 = vmatpush1.bf16.msra.mxu1 %v1635_v10  ;;  %v1727_v10 = vld [vmem:[%s2410_s0 + $0x1e0] ss:$8 sps:$4 sm:$0xff]  }
  0x1f   :  { %566 = vmatprep.subr.bf16.mxu0 %v1734_v0  ;;  %1614 = vmatprep.subr.bf16.mxu1 %v1734_v0 }
  0x22   :  { %567 = vmatpush1.bf16.msra.mxu0 %v1636_v13  ;;  %1624 = vmatpush1.bf16.msra.mxu1 %v1636_v13  ;;  %v1732_v13 = vld [vmem:[%s2410_s0 + $0xf0] ss:$8 sps:$4 sm:$0xff]  }
  0x23   :  { %568 = vmatprep.subr.bf16.mxu0 %v1734_v0  ;;  %1615 = vmatprep.subr.bf16.mxu1 %v1734_v0  ;;  %v1712_v0 = vld [vmem:[%s2410_s0 + $0x1c4] ss:$8 sps:$4 sm:$0xff]  }
  0x26   :  { %569 = vmatpush1.bf16.msra.mxu0 %v548_v16  ;;  %1625 = vmatpush1.bf16.msra.mxu1 %v548_v16 }
  0x29   :  { %583 = vmatmul.mubr.bf16.vlgmr.msra.gmra.mrb[0].mxu0 %v1638_v17  ;;  %711 = vmatmul.mubr.bf16.vlgmr.msra.gmra.mrb[0].mxu1 %v1641_v18  ;;  %v2023_v17 = vld [vmem:[%s2412_s3] ss:$0 sm:$0xff] }
  0x2a   :  { %1445 = vmatprep.mubr.msk.bf16.mxu0 %vm446_vm0, %v1644_v19  ;;  %1461 = vmatprep.mubr.msk.bf16.mxu1 %vm446_vm0, %v1646_v20 }
  0x31   :  { %591 = vmatmul.mubr.bf16.gmra.mrb[4].mxu0 %v1648_v21  ;;  %719 = vmatmul.mubr.bf16.gmra.mrb[4].mxu1 %v1649_v22 }
  0x32   :  { %1446 = vmatprep.mubr.msk.bf16.mxu0 %vm446_vm0, %v1650_v23  ;;  %1462 = vmatprep.mubr.msk.bf16.mxu1 %vm446_vm0, %v1652_v24 }
  0x39   :  { %599 = vmatmul.mubr.bf16.gmra.mrb[8].mxu0 %v1654_v25  ;;  %727 = vmatmul.mubr.bf16.gmra.mrb[8].mxu1 %v1655_v26 }
  0x3a   :  { %1447 = vmatprep.mubr.msk.bf16.mxu0 %vm446_vm0, %v1656_v27  ;;  %1463 = vmatprep.mubr.msk.bf16.mxu1 %vm446_vm0, %v1658_v28 }
  0x41   :  { %607 = vmatmul.mubr.bf16.gmra.mrb[12].mxu0 %v1660_v29  ;;  %735 = vmatmul.mubr.bf16.gmra.mrb[12].mxu1 %v1661_v30 }
  0x42   :  { %1448 = vmatprep.mubr.msk.bf16.mxu0 %vm446_vm0, %v1662_v31  ;;  %1464 = vmatprep.mubr.msk.bf16.mxu1 %vm446_vm0, %v1664_v32 }
  0x49   :  { %615 = vmatmul.mubr.bf16.gmra.mrb[16].mxu0 %v1666_v33  ;;  %743 = vmatmul.mubr.bf16.gmra.mrb[16].mxu1 %v1667_v34 }
  0x4a   :  { %1449 = vmatprep.mubr.msk.bf16.mxu0 %vm446_vm0, %v1668_v35  ;;  %1465 = vmatprep.mubr.msk.bf16.mxu1 %vm446_vm0, %v1670_v36 }
  0x51   :  { %623 = vmatmul.mubr.bf16.gmra.mrb[20].mxu0 %v1672_v37  ;;  %751 = vmatmul.mubr.bf16.gmra.mrb[20].mxu1 %v1673_v38 }
  0x52   :  { %1450 = vmatprep.mubr.msk.bf16.mxu0 %vm446_vm0, %v1674_v39  ;;  %1466 = vmatprep.mubr.msk.bf16.mxu1 %vm446_vm0, %v1676_v40 }
  0x59   :  { %631 = vmatmul.mubr.bf16.gmra.mrb[24].mxu0 %v1678_v41  ;;  %759 = vmatmul.mubr.bf16.gmra.mrb[24].mxu1 %v1679_v42 }
  0x5a   :  { %1451 = vmatprep.mubr.msk.bf16.mxu0 %vm446_vm0, %v1680_v43  ;;  %1467 = vmatprep.mubr.msk.bf16.mxu1 %vm446_vm0, %v1682_v44 }
  0x61   :  { %639 = vmatmul.mubr.bf16.gmra.mrb[28].mxu0 %v1684_v45  ;;  %767 = vmatmul.mubr.bf16.gmra.mrb[28].mxu1 %v1685_v46 }
  0x62   :  { %1452 = vmatprep.mubr.msk.bf16.mxu0 %vm446_vm0, %v1686_v47  ;;  %1468 = vmatprep.mubr.msk.bf16.mxu1 %vm446_vm0, %v1688_v48 }
  0x69   :  { %647 = vmatmul.mubr.bf16.gmra.mrb[32].mxu0 %v1690_v49  ;;  %775 = vmatmul.mubr.bf16.gmra.mrb[32].mxu1 %v1691_v50 }
  0x6a   :  { %1453 = vmatprep.mubr.msk.bf16.mxu0 %vm446_vm0, %v1692_v51  ;;  %1469 = vmatprep.mubr.msk.bf16.mxu1 %vm446_vm0, %v1694_v52 }
  0x71   :  { %655 = vmatmul.mubr.bf16.gmra.mrb[36].mxu0 %v1696_v53  ;;  %783 = vmatmul.mubr.bf16.gmra.mrb[36].mxu1 %v1697_v54 }
  0x72   :  { %1454 = vmatprep.mubr.msk.bf16.mxu0 %vm446_vm0, %v1698_v55  ;;  %1470 = vmatprep.mubr.msk.bf16.mxu1 %vm446_vm0, %v1700_v56 }
  0x79   :  { %663 = vmatmul.mubr.bf16.gmra.mrb[40].mxu0 %v1702_v57  ;;  %791 = vmatmul.mubr.bf16.gmra.mrb[40].mxu1 %v1703_v58 }
  0x7a   :  { %1455 = vmatprep.mubr.msk.bf16.mxu0 %vm446_vm0, %v1704_v59  ;;  %1471 = vmatprep.mubr.msk.bf16.mxu1 %vm446_vm0, %v1706_v60 }
  0x81   :  { %671 = vmatmul.mubr.bf16.gmra.mrb[44].mxu0 %v1708_v61  ;;  %799 = vmatmul.mubr.bf16.gmra.mrb[44].mxu1 %v1709_v62 }
  0x82   :  { %1456 = vmatprep.mubr.msk.bf16.mxu0 %vm446_vm0, %v1710_v63  ;;  %1472 = vmatprep.mubr.msk.bf16.mxu1 %vm446_vm0, %v1712_v0 }
  0x89   :  { %679 = vmatmul.mubr.bf16.gmra.mrb[48].mxu0 %v1714_v1  ;;  %807 = vmatmul.mubr.bf16.gmra.mrb[48].mxu1 %v1715_v2 }
  0x8a   :  { %1457 = vmatprep.mubr.msk.bf16.mxu0 %vm446_vm0, %v1716_v3  ;;  %1473 = vmatprep.mubr.msk.bf16.mxu1 %vm446_vm0, %v1718_v4 }
  0x91   :  { %687 = vmatmul.mubr.bf16.gmra.mrb[52].mxu0 %v1720_v5  ;;  %815 = vmatmul.mubr.bf16.gmra.mrb[52].mxu1 %v1721_v6 }
  0x92   :  { %1458 = vmatprep.mubr.msk.bf16.mxu0 %vm446_vm0, %v1722_v7  ;;  %1474 = vmatprep.mubr.msk.bf16.mxu1 %vm446_vm0, %v1724_v8 }
  0x99   :  { %695 = vmatmul.mubr.bf16.gmra.mrb[56].mxu0 %v1726_v9  ;;  %823 = vmatmul.mubr.bf16.gmra.mrb[56].mxu1 %v1727_v10 }
  0x9a   :  { %1459 = vmatprep.mubr.msk.bf16.mxu0 %vm446_vm0, %v1728_v11  ;;  %1475 = vmatprep.mubr.msk.bf16.mxu1 %vm446_vm0, %v1730_v12 }
  0xa1   :  { %703 = vmatmul.mubr.bf16.gmra.mrb[60].mxu0 %v1732_v13  ;;  %831 = vmatmul.mubr.bf16.gmra.mrb[60].mxu1 %v1733_v14 }
  0xfc   :  { %v584_v16 = vpop.f32.mrb[0].mxu0  ;;  %v712_v18 = vpop.f32.mrb[0].mxu1 }
  0xfd   :  { %v846_v19 = vmul.f32 %v2018_v15, %v584_v16  ;;  %v878_v20 = vmul.f32 %v2018_v15, %v712_v18  ;;  %v586_v21 = vpop.f32.mrb[1].mxu0  ;;  %v714_v22 = vpop.f32.mrb[1].mxu1 }
  0xfe   :  { %v587_v23 = vpop.f32.mrb[2].mxu0  ;;  %v715_v24 = vpop.f32.mrb[2].mxu1 }
  0xff   :  { %v917_v25 = vadd.f32 %v2023_v17, %v846_v19  ;;  %v949_v26 = vadd.f32 %v2023_v17, %v878_v20  ;;  %v847_v27 = vmul.f32 %v2018_v15, %v587_v23  ;;  %v879_v28 = vmul.f32 %v2018_v15, %v715_v24  ;;  %v589_v29 = vpop.f32.mrb[3].mxu0  ;;  %v717_v30 = vpop.f32.mrb[3].mxu1 }
 0x101   :  { %v981_v31 = vmax.f32 %v917_v25, 0.0  ;;  %v1013_v32 = vmax.f32 %v949_v26, 0.0  ;;  %v918_v33 = vadd.f32 %v2023_v17, %v847_v27  ;;  %v950_v34 = vadd.f32 %v2023_v17, %v879_v28 }
 0x103   :  { %v1542_v35 = vpack.c.bf16 %v981_v31, %v981_v31  ;;  %v1574_v36 = vpack.c.bf16 %v1013_v32, %v1013_v32  ;;  %v982_v37 = vmax.f32 %v918_v33, 0.0  ;;  %v1014_v38 = vmax.f32 %v950_v34, 0.0 }
 0x104   :  { %v592_v39 = vpop.f32.mrb[4].mxu0  ;;  %v720_v40 = vpop.f32.mrb[4].mxu1 }
 0x105   :  { %1302 = vst.msk [vmem:[%s2413_s4] sm:$0xf] %vm1301_vm3, %v1542_v35  ;;  %1334 = vst.msk [vmem:[%s2413_s4 + $0x80] sm:$0xf] %vm1301_vm3, %v1574_v36  ;;  %v1543_v41 = vpack.c.bf16 %v982_v37, %v982_v37  ;;  %v1575_v42 = vpack.c.bf16 %v1014_v38, %v1014_v38  ;;  %v848_v43 = vmul.f32 %v2018_v15, %v592_v39  ;;  %v594_v45 = vpop.f32.mrb[5].mxu0  ;;  %v722_v46 = vpop.f32.mrb[5].mxu1 }
 0x106   :  { %v880_v44 = vmul.f32 %v2018_v15, %v720_v40  ;;  %v595_v47 = vpop.f32.mrb[6].mxu0  ;;  %v723_v48 = vpop.f32.mrb[6].mxu1 }
 0x107   :  { %1303 = vst.msk [vmem:[%s2413_s4 + $0x4] sm:$0xf] %vm1301_vm3, %v1543_v41  ;;  %1335 = vst.msk [vmem:[%s2413_s4 + $0x84] sm:$0xf] %vm1301_vm3, %v1575_v42  ;;  %v919_v49 = vadd.f32 %v2023_v17, %v848_v43  ;;  %v849_v51 = vmul.f32 %v2018_v15, %v595_v47  ;;  %v881_v52 = vmul.f32 %v2018_v15, %v723_v48  ;;  %v597_v53 = vpop.f32.mrb[7].mxu0  ;;  %v725_v54 = vpop.f32.mrb[7].mxu1 }
 0x108   :  { %v951_v50 = vadd.f32 %v2023_v17, %v880_v44 }
 0x109   :  { %v983_v55 = vmax.f32 %v919_v49, 0.0  ;;  %v920_v57 = vadd.f32 %v2023_v17, %v849_v51  ;;  %v952_v58 = vadd.f32 %v2023_v17, %v881_v52 }
 0x10a   :  { %v1015_v56 = vmax.f32 %v951_v50, 0.0 }
 0x10b   :  { %v1544_v59 = vpack.c.bf16 %v983_v55, %v983_v55  ;;  %v984_v61 = vmax.f32 %v920_v57, 0.0  ;;  %v1016_v62 = vmax.f32 %v952_v58, 0.0 }
 0x10c   :  { %v1576_v60 = vpack.c.bf16 %v1015_v56, %v1015_v56  ;;  %v600_v63 = vpop.f32.mrb[8].mxu0  ;;  %v728_v0 = vpop.f32.mrb[8].mxu1 }
 0x10d   :  { %1304 = vst.msk [vmem:[%s2413_s4 + $0x8] sm:$0xf] %vm1301_vm3, %v1544_v59  ;;  %v1545_v1 = vpack.c.bf16 %v984_v61, %v984_v61  ;;  %v1577_v2 = vpack.c.bf16 %v1016_v62, %v1016_v62  ;;  %v850_v3 = vmul.f32 %v2018_v15, %v600_v63  ;;  %v882_v4 = vmul.f32 %v2018_v15, %v728_v0  ;;  %v602_v5 = vpop.f32.mrb[9].mxu0  ;;  %v730_v6 = vpop.f32.mrb[9].mxu1 }
 0x10e   :  { %1336 = vst.msk [vmem:[%s2413_s4 + $0x88] sm:$0xf] %vm1301_vm3, %v1576_v60  ;;  %v603_v7 = vpop.f32.mrb[10].mxu0  ;;  %v731_v8 = vpop.f32.mrb[10].mxu1 }
 0x10f   :  { %1305 = vst.msk [vmem:[%s2413_s4 + $0xc] sm:$0xf] %vm1301_vm3, %v1545_v1  ;;  %1337 = vst.msk [vmem:[%s2413_s4 + $0x8c] sm:$0xf] %vm1301_vm3, %v1577_v2  ;;  %v921_v9 = vadd.f32 %v2023_v17, %v850_v3  ;;  %v953_v10 = vadd.f32 %v2023_v17, %v882_v4  ;;  %v851_v11 = vmul.f32 %v2018_v15, %v603_v7  ;;  %v605_v13 = vpop.f32.mrb[11].mxu0  ;;  %v733_v14 = vpop.f32.mrb[11].mxu1 }
 0x110   :  { %v883_v12 = vmul.f32 %v2018_v15, %v731_v8 }
 0x111   :  { %v985_v16 = vmax.f32 %v921_v9, 0.0  ;;  %v1017_v18 = vmax.f32 %v953_v10, 0.0  ;;  %v922_v19 = vadd.f32 %v2023_v17, %v851_v11 }
 0x112   :  { %v954_v20 = vadd.f32 %v2023_v17, %v883_v12 }
 0x113   :  { %v1546_v21 = vpack.c.bf16 %v985_v16, %v985_v16  ;;  %v1578_v22 = vpack.c.bf16 %v1017_v18, %v1017_v18  ;;  %v986_v23 = vmax.f32 %v922_v19, 0.0 }
 0x114   :  { %v1018_v24 = vmax.f32 %v954_v20, 0.0  ;;  %v608_v25 = vpop.f32.mrb[12].mxu0  ;;  %v736_v26 = vpop.f32.mrb[12].mxu1 }
 0x115   :  { %1306 = vst.msk [vmem:[%s2413_s4 + $0x10] sm:$0xf] %vm1301_vm3, %v1546_v21  ;;  %1338 = vst.msk [vmem:[%s2413_s4 + $0x90] sm:$0xf] %vm1301_vm3, %v1578_v22  ;;  %v1547_v27 = vpack.c.bf16 %v986_v23, %v986_v23  ;;  %v852_v29 = vmul.f32 %v2018_v15, %v608_v25  ;;  %v884_v30 = vmul.f32 %v2018_v15, %v736_v26  ;;  %v610_v31 = vpop.f32.mrb[13].mxu0  ;;  %v738_v32 = vpop.f32.mrb[13].mxu1 }
 0x116   :  { %v1579_v28 = vpack.c.bf16 %v1018_v24, %v1018_v24  ;;  %v611_v33 = vpop.f32.mrb[14].mxu0  ;;  %v739_v34 = vpop.f32.mrb[14].mxu1 }
 0x117   :  { %1307 = vst.msk [vmem:[%s2413_s4 + $0x14] sm:$0xf] %vm1301_vm3, %v1547_v27  ;;  %v923_v35 = vadd.f32 %v2023_v17, %v852_v29  ;;  %v955_v36 = vadd.f32 %v2023_v17, %v884_v30  ;;  %v853_v37 = vmul.f32 %v2018_v15, %v611_v33  ;;  %v885_v38 = vmul.f32 %v2018_v15, %v739_v34  ;;  %v613_v39 = vpop.f32.mrb[15].mxu0  ;;  %v741_v40 = vpop.f32.mrb[15].mxu1 }
 0x118   :  { %1339 = vst.msk [vmem:[%s2413_s4 + $0x94] sm:$0xf] %vm1301_vm3, %v1579_v28 }
 0x119   :  { %v987_v41 = vmax.f32 %v923_v35, 0.0  ;;  %v1019_v42 = vmax.f32 %v955_v36, 0.0  ;;  %v924_v43 = vadd.f32 %v2023_v17, %v853_v37  ;;  %v956_v44 = vadd.f32 %v2023_v17, %v885_v38 }
 0x11b   :  { %v1548_v45 = vpack.c.bf16 %v987_v41, %v987_v41  ;;  %v1580_v46 = vpack.c.bf16 %v1019_v42, %v1019_v42  ;;  %v988_v47 = vmax.f32 %v924_v43, 0.0  ;;  %v1020_v48 = vmax.f32 %v956_v44, 0.0 }
 0x11c   :  { %v616_v49 = vpop.f32.mrb[16].mxu0  ;;  %v744_v50 = vpop.f32.mrb[16].mxu1 }
 0x11d   :  { %1308 = vst.msk [vmem:[%s2413_s4 + $0x18] sm:$0xf] %vm1301_vm3, %v1548_v45  ;;  %1340 = vst.msk [vmem:[%s2413_s4 + $0x98] sm:$0xf] %vm1301_vm3, %v1580_v46  ;;  %v1549_v51 = vpack.c.bf16 %v988_v47, %v988_v47  ;;  %v1581_v52 = vpack.c.bf16 %v1020_v48, %v1020_v48  ;;  %v854_v53 = vmul.f32 %v2018_v15, %v616_v49  ;;  %v618_v55 = vpop.f32.mrb[17].mxu0  ;;  %v746_v56 = vpop.f32.mrb[17].mxu1 }
 0x11e   :  { %v886_v54 = vmul.f32 %v2018_v15, %v744_v50  ;;  %v619_v57 = vpop.f32.mrb[18].mxu0  ;;  %v747_v58 = vpop.f32.mrb[18].mxu1 }
 0x11f   :  { %1309 = vst.msk [vmem:[%s2413_s4 + $0x1c] sm:$0xf] %vm1301_vm3, %v1549_v51  ;;  %1341 = vst.msk [vmem:[%s2413_s4 + $0x9c] sm:$0xf] %vm1301_vm3, %v1581_v52  ;;  %v925_v59 = vadd.f32 %v2023_v17, %v854_v53  ;;  %v855_v61 = vmul.f32 %v2018_v15, %v619_v57  ;;  %v887_v62 = vmul.f32 %v2018_v15, %v747_v58  ;;  %v621_v63 = vpop.f32.mrb[19].mxu0  ;;  %v749_v0 = vpop.f32.mrb[19].mxu1 }
 0x120   :  { %v957_v60 = vadd.f32 %v2023_v17, %v886_v54 }
 0x121   :  { %v989_v1 = vmax.f32 %v925_v59, 0.0  ;;  %v926_v3 = vadd.f32 %v2023_v17, %v855_v61  ;;  %v958_v4 = vadd.f32 %v2023_v17, %v887_v62 }
 0x122   :  { %v1021_v2 = vmax.f32 %v957_v60, 0.0 }
 0x123   :  { %v1550_v5 = vpack.c.bf16 %v989_v1, %v989_v1  ;;  %v990_v7 = vmax.f32 %v926_v3, 0.0  ;;  %v1022_v8 = vmax.f32 %v958_v4, 0.0 }
 0x124   :  { %v1582_v6 = vpack.c.bf16 %v1021_v2, %v1021_v2  ;;  %v624_v9 = vpop.f32.mrb[20].mxu0  ;;  %v752_v10 = vpop.f32.mrb[20].mxu1 }
 0x125   :  { %1310 = vst.msk [vmem:[%s2413_s4 + $0x20] sm:$0xf] %vm1301_vm3, %v1550_v5  ;;  %v1551_v11 = vpack.c.bf16 %v990_v7, %v990_v7  ;;  %v1583_v12 = vpack.c.bf16 %v1022_v8, %v1022_v8  ;;  %v856_v13 = vmul.f32 %v2018_v15, %v624_v9  ;;  %v888_v14 = vmul.f32 %v2018_v15, %v752_v10  ;;  %v626_v16 = vpop.f32.mrb[21].mxu0  ;;  %v754_v18 = vpop.f32.mrb[21].mxu1 }
 0x126   :  { %1342 = vst.msk [vmem:[%s2413_s4 + $0xa0] sm:$0xf] %vm1301_vm3, %v1582_v6  ;;  %v627_v19 = vpop.f32.mrb[22].mxu0  ;;  %v755_v20 = vpop.f32.mrb[22].mxu1 }
 0x127   :  { %1311 = vst.msk [vmem:[%s2413_s4 + $0x24] sm:$0xf] %vm1301_vm3, %v1551_v11  ;;  %1343 = vst.msk [vmem:[%s2413_s4 + $0xa4] sm:$0xf] %vm1301_vm3, %v1583_v12  ;;  %v927_v21 = vadd.f32 %v2023_v17, %v856_v13  ;;  %v959_v22 = vadd.f32 %v2023_v17, %v888_v14  ;;  %v857_v23 = vmul.f32 %v2018_v15, %v627_v19  ;;  %v629_v25 = vpop.f32.mrb[23].mxu0  ;;  %v757_v26 = vpop.f32.mrb[23].mxu1 }
 0x128   :  { %v889_v24 = vmul.f32 %v2018_v15, %v755_v20 }
 0x129   :  { %v991_v27 = vmax.f32 %v927_v21, 0.0  ;;  %v1023_v28 = vmax.f32 %v959_v22, 0.0  ;;  %v928_v29 = vadd.f32 %v2023_v17, %v857_v23 }
 0x12a   :  { %v960_v30 = vadd.f32 %v2023_v17, %v889_v24 }
 0x12b   :  { %v1552_v31 = vpack.c.bf16 %v991_v27, %v991_v27  ;;  %v1584_v32 = vpack.c.bf16 %v1023_v28, %v1023_v28  ;;  %v992_v33 = vmax.f32 %v928_v29, 0.0 }
 0x12c   :  { %v1024_v34 = vmax.f32 %v960_v30, 0.0  ;;  %v632_v35 = vpop.f32.mrb[24].mxu0  ;;  %v760_v36 = vpop.f32.mrb[24].mxu1 }
 0x12d   :  { %1312 = vst.msk [vmem:[%s2413_s4 + $0x28] sm:$0xf] %vm1301_vm3, %v1552_v31  ;;  %1344 = vst.msk [vmem:[%s2413_s4 + $0xa8] sm:$0xf] %vm1301_vm3, %v1584_v32  ;;  %v1553_v37 = vpack.c.bf16 %v992_v33, %v992_v33  ;;  %v858_v39 = vmul.f32 %v2018_v15, %v632_v35  ;;  %v890_v40 = vmul.f32 %v2018_v15, %v760_v36  ;;  %v634_v41 = vpop.f32.mrb[25].mxu0  ;;  %v762_v42 = vpop.f32.mrb[25].mxu1 }
 0x12e   :  { %v1585_v38 = vpack.c.bf16 %v1024_v34, %v1024_v34  ;;  %v635_v43 = vpop.f32.mrb[26].mxu0  ;;  %v763_v44 = vpop.f32.mrb[26].mxu1 }
 0x12f   :  { %1313 = vst.msk [vmem:[%s2413_s4 + $0x2c] sm:$0xf] %vm1301_vm3, %v1553_v37  ;;  %v929_v45 = vadd.f32 %v2023_v17, %v858_v39  ;;  %v961_v46 = vadd.f32 %v2023_v17, %v890_v40  ;;  %v859_v47 = vmul.f32 %v2018_v15, %v635_v43  ;;  %v891_v48 = vmul.f32 %v2018_v15, %v763_v44  ;;  %v637_v49 = vpop.f32.mrb[27].mxu0  ;;  %v765_v50 = vpop.f32.mrb[27].mxu1 }
 0x130   :  { %1345 = vst.msk [vmem:[%s2413_s4 + $0xac] sm:$0xf] %vm1301_vm3, %v1585_v38 }
 0x131   :  { %v993_v51 = vmax.f32 %v929_v45, 0.0  ;;  %v1025_v52 = vmax.f32 %v961_v46, 0.0  ;;  %v930_v53 = vadd.f32 %v2023_v17, %v859_v47  ;;  %v962_v54 = vadd.f32 %v2023_v17, %v891_v48 }
 0x133   :  { %v1554_v55 = vpack.c.bf16 %v993_v51, %v993_v51  ;;  %v1586_v56 = vpack.c.bf16 %v1025_v52, %v1025_v52  ;;  %v994_v57 = vmax.f32 %v930_v53, 0.0  ;;  %v1026_v58 = vmax.f32 %v962_v54, 0.0 }
 0x134   :  { %v640_v59 = vpop.f32.mrb[28].mxu0  ;;  %v768_v60 = vpop.f32.mrb[28].mxu1 }
 0x135   :  { %1314 = vst.msk [vmem:[%s2413_s4 + $0x30] sm:$0xf] %vm1301_vm3, %v1554_v55  ;;  %1346 = vst.msk [vmem:[%s2413_s4 + $0xb0] sm:$0xf] %vm1301_vm3, %v1586_v56  ;;  %v1555_v61 = vpack.c.bf16 %v994_v57, %v994_v57  ;;  %v1587_v62 = vpack.c.bf16 %v1026_v58, %v1026_v58  ;;  %v860_v63 = vmul.f32 %v2018_v15, %v640_v59  ;;  %v642_v1 = vpop.f32.mrb[29].mxu0  ;;  %v770_v2 = vpop.f32.mrb[29].mxu1 }
 0x136   :  { %v892_v0 = vmul.f32 %v2018_v15, %v768_v60  ;;  %v643_v3 = vpop.f32.mrb[30].mxu0  ;;  %v771_v4 = vpop.f32.mrb[30].mxu1 }
 0x137   :  { %1315 = vst.msk [vmem:[%s2413_s4 + $0x34] sm:$0xf] %vm1301_vm3, %v1555_v61  ;;  %1347 = vst.msk [vmem:[%s2413_s4 + $0xb4] sm:$0xf] %vm1301_vm3, %v1587_v62  ;;  %v931_v5 = vadd.f32 %v2023_v17, %v860_v63  ;;  %v861_v7 = vmul.f32 %v2018_v15, %v643_v3  ;;  %v893_v8 = vmul.f32 %v2018_v15, %v771_v4  ;;  %v645_v9 = vpop.f32.mrb[31].mxu0  ;;  %v773_v10 = vpop.f32.mrb[31].mxu1 }
 0x138   :  { %v963_v6 = vadd.f32 %v2023_v17, %v892_v0 }
 0x139   :  { %v995_v11 = vmax.f32 %v931_v5, 0.0  ;;  %v932_v13 = vadd.f32 %v2023_v17, %v861_v7  ;;  %v964_v14 = vadd.f32 %v2023_v17, %v893_v8 }
 0x13a   :  { %v1027_v12 = vmax.f32 %v963_v6, 0.0 }
 0x13b   :  { %v1556_v16 = vpack.c.bf16 %v995_v11, %v995_v11  ;;  %v996_v19 = vmax.f32 %v932_v13, 0.0  ;;  %v1028_v20 = vmax.f32 %v964_v14, 0.0 }
 0x13c   :  { %v1588_v18 = vpack.c.bf16 %v1027_v12, %v1027_v12  ;;  %v648_v21 = vpop.f32.mrb[32].mxu0  ;;  %v776_v22 = vpop.f32.mrb[32].mxu1 }
 0x13d   :  { %1316 = vst.msk [vmem:[%s2413_s4 + $0x38] sm:$0xf] %vm1301_vm3, %v1556_v16  ;;  %v1557_v23 = vpack.c.bf16 %v996_v19, %v996_v19  ;;  %v1589_v24 = vpack.c.bf16 %v1028_v20, %v1028_v20  ;;  %v862_v25 = vmul.f32 %v2018_v15, %v648_v21  ;;  %v894_v26 = vmul.f32 %v2018_v15, %v776_v22  ;;  %v650_v27 = vpop.f32.mrb[33].mxu0  ;;  %v778_v28 = vpop.f32.mrb[33].mxu1 }
 0x13e   :  { %1348 = vst.msk [vmem:[%s2413_s4 + $0xb8] sm:$0xf] %vm1301_vm3, %v1588_v18  ;;  %v651_v29 = vpop.f32.mrb[34].mxu0  ;;  %v779_v30 = vpop.f32.mrb[34].mxu1 }
 0x13f   :  { %1317 = vst.msk [vmem:[%s2413_s4 + $0x3c] sm:$0xf] %vm1301_vm3, %v1557_v23  ;;  %1349 = vst.msk [vmem:[%s2413_s4 + $0xbc] sm:$0xf] %vm1301_vm3, %v1589_v24  ;;  %v933_v31 = vadd.f32 %v2023_v17, %v862_v25  ;;  %v965_v32 = vadd.f32 %v2023_v17, %v894_v26  ;;  %v863_v33 = vmul.f32 %v2018_v15, %v651_v29  ;;  %v653_v35 = vpop.f32.mrb[35].mxu0  ;;  %v781_v36 = vpop.f32.mrb[35].mxu1 }
 0x140   :  { %v895_v34 = vmul.f32 %v2018_v15, %v779_v30 }
 0x141   :  { %v997_v37 = vmax.f32 %v933_v31, 0.0  ;;  %v1029_v38 = vmax.f32 %v965_v32, 0.0  ;;  %v934_v39 = vadd.f32 %v2023_v17, %v863_v33 }
 0x142   :  { %v966_v40 = vadd.f32 %v2023_v17, %v895_v34 }
 0x143   :  { %v1558_v41 = vpack.c.bf16 %v997_v37, %v997_v37  ;;  %v1590_v42 = vpack.c.bf16 %v1029_v38, %v1029_v38  ;;  %v998_v43 = vmax.f32 %v934_v39, 0.0 }
 0x144   :  { %v1030_v44 = vmax.f32 %v966_v40, 0.0  ;;  %v656_v45 = vpop.f32.mrb[36].mxu0  ;;  %v784_v46 = vpop.f32.mrb[36].mxu1 }
 0x145   :  { %1318 = vst.msk [vmem:[%s2413_s4 + $0x40] sm:$0xf] %vm1301_vm3, %v1558_v41  ;;  %1350 = vst.msk [vmem:[%s2413_s4 + $0xc0] sm:$0xf] %vm1301_vm3, %v1590_v42  ;;  %v1559_v47 = vpack.c.bf16 %v998_v43, %v998_v43  ;;  %v864_v49 = vmul.f32 %v2018_v15, %v656_v45  ;;  %v896_v50 = vmul.f32 %v2018_v15, %v784_v46  ;;  %v658_v51 = vpop.f32.mrb[37].mxu0  ;;  %v786_v52 = vpop.f32.mrb[37].mxu1 }
 0x146   :  { %v1591_v48 = vpack.c.bf16 %v1030_v44, %v1030_v44  ;;  %v659_v53 = vpop.f32.mrb[38].mxu0  ;;  %v787_v54 = vpop.f32.mrb[38].mxu1 }
 0x147   :  { %1319 = vst.msk [vmem:[%s2413_s4 + $0x44] sm:$0xf] %vm1301_vm3, %v1559_v47  ;;  %v935_v55 = vadd.f32 %v2023_v17, %v864_v49  ;;  %v967_v56 = vadd.f32 %v2023_v17, %v896_v50  ;;  %v865_v57 = vmul.f32 %v2018_v15, %v659_v53  ;;  %v897_v58 = vmul.f32 %v2018_v15, %v787_v54  ;;  %v661_v59 = vpop.f32.mrb[39].mxu0  ;;  %v789_v60 = vpop.f32.mrb[39].mxu1 }
 0x148   :  { %1351 = vst.msk [vmem:[%s2413_s4 + $0xc4] sm:$0xf] %vm1301_vm3, %v1591_v48 }
 0x149   :  { %v999_v61 = vmax.f32 %v935_v55, 0.0  ;;  %v1031_v62 = vmax.f32 %v967_v56, 0.0  ;;  %v936_v63 = vadd.f32 %v2023_v17, %v865_v57  ;;  %v968_v0 = vadd.f32 %v2023_v17, %v897_v58 }
 0x14b   :  { %v1560_v1 = vpack.c.bf16 %v999_v61, %v999_v61  ;;  %v1592_v2 = vpack.c.bf16 %v1031_v62, %v1031_v62  ;;  %v1000_v3 = vmax.f32 %v936_v63, 0.0  ;;  %v1032_v4 = vmax.f32 %v968_v0, 0.0 }
 0x14c   :  { %v664_v5 = vpop.f32.mrb[40].mxu0  ;;  %v792_v6 = vpop.f32.mrb[40].mxu1 }
 0x14d   :  { %1320 = vst.msk [vmem:[%s2413_s4 + $0x48] sm:$0xf] %vm1301_vm3, %v1560_v1  ;;  %1352 = vst.msk [vmem:[%s2413_s4 + $0xc8] sm:$0xf] %vm1301_vm3, %v1592_v2  ;;  %v1561_v7 = vpack.c.bf16 %v1000_v3, %v1000_v3  ;;  %v1593_v8 = vpack.c.bf16 %v1032_v4, %v1032_v4  ;;  %v866_v9 = vmul.f32 %v2018_v15, %v664_v5  ;;  %v666_v11 = vpop.f32.mrb[41].mxu0  ;;  %v794_v12 = vpop.f32.mrb[41].mxu1 }
 0x14e   :  { %v898_v10 = vmul.f32 %v2018_v15, %v792_v6  ;;  %v667_v13 = vpop.f32.mrb[42].mxu0  ;;  %v795_v14 = vpop.f32.mrb[42].mxu1 }
 0x14f   :  { %1321 = vst.msk [vmem:[%s2413_s4 + $0x4c] sm:$0xf] %vm1301_vm3, %v1561_v7  ;;  %1353 = vst.msk [vmem:[%s2413_s4 + $0xcc] sm:$0xf] %vm1301_vm3, %v1593_v8  ;;  %v937_v16 = vadd.f32 %v2023_v17, %v866_v9  ;;  %v867_v19 = vmul.f32 %v2018_v15, %v667_v13  ;;  %v899_v20 = vmul.f32 %v2018_v15, %v795_v14  ;;  %v669_v21 = vpop.f32.mrb[43].mxu0  ;;  %v797_v22 = vpop.f32.mrb[43].mxu1 }
 0x150   :  { %v969_v18 = vadd.f32 %v2023_v17, %v898_v10 }
 0x151   :  { %v1001_v23 = vmax.f32 %v937_v16, 0.0  ;;  %v938_v25 = vadd.f32 %v2023_v17, %v867_v19  ;;  %v970_v26 = vadd.f32 %v2023_v17, %v899_v20 }
 0x152   :  { %v1033_v24 = vmax.f32 %v969_v18, 0.0 }
 0x153   :  { %v1562_v27 = vpack.c.bf16 %v1001_v23, %v1001_v23  ;;  %v1002_v29 = vmax.f32 %v938_v25, 0.0  ;;  %v1034_v30 = vmax.f32 %v970_v26, 0.0 }
 0x154   :  { %v1594_v28 = vpack.c.bf16 %v1033_v24, %v1033_v24  ;;  %v672_v31 = vpop.f32.mrb[44].mxu0  ;;  %v800_v32 = vpop.f32.mrb[44].mxu1 }
 0x155   :  { %1322 = vst.msk [vmem:[%s2413_s4 + $0x50] sm:$0xf] %vm1301_vm3, %v1562_v27  ;;  %v1563_v33 = vpack.c.bf16 %v1002_v29, %v1002_v29  ;;  %v1595_v34 = vpack.c.bf16 %v1034_v30, %v1034_v30  ;;  %v868_v35 = vmul.f32 %v2018_v15, %v672_v31  ;;  %v900_v36 = vmul.f32 %v2018_v15, %v800_v32  ;;  %v674_v37 = vpop.f32.mrb[45].mxu0  ;;  %v802_v38 = vpop.f32.mrb[45].mxu1 }
 0x156   :  { %1354 = vst.msk [vmem:[%s2413_s4 + $0xd0] sm:$0xf] %vm1301_vm3, %v1594_v28  ;;  %v675_v39 = vpop.f32.mrb[46].mxu0  ;;  %v803_v40 = vpop.f32.mrb[46].mxu1 }
 0x157   :  { %1323 = vst.msk [vmem:[%s2413_s4 + $0x54] sm:$0xf] %vm1301_vm3, %v1563_v33  ;;  %1355 = vst.msk [vmem:[%s2413_s4 + $0xd4] sm:$0xf] %vm1301_vm3, %v1595_v34  ;;  %v939_v41 = vadd.f32 %v2023_v17, %v868_v35  ;;  %v971_v42 = vadd.f32 %v2023_v17, %v900_v36  ;;  %v869_v43 = vmul.f32 %v2018_v15, %v675_v39  ;;  %v677_v45 = vpop.f32.mrb[47].mxu0  ;;  %v805_v46 = vpop.f32.mrb[47].mxu1 }
 0x158   :  { %v901_v44 = vmul.f32 %v2018_v15, %v803_v40 }
 0x159   :  { %v1003_v47 = vmax.f32 %v939_v41, 0.0  ;;  %v1035_v48 = vmax.f32 %v971_v42, 0.0  ;;  %v940_v49 = vadd.f32 %v2023_v17, %v869_v43 }
 0x15a   :  { %v972_v50 = vadd.f32 %v2023_v17, %v901_v44 }
 0x15b   :  { %v1564_v51 = vpack.c.bf16 %v1003_v47, %v1003_v47  ;;  %v1596_v52 = vpack.c.bf16 %v1035_v48, %v1035_v48  ;;  %v1004_v53 = vmax.f32 %v940_v49, 0.0 }
 0x15c   :  { %v1036_v54 = vmax.f32 %v972_v50, 0.0  ;;  %v680_v55 = vpop.f32.mrb[48].mxu0  ;;  %v808_v56 = vpop.f32.mrb[48].mxu1 }
 0x15d   :  { %1324 = vst.msk [vmem:[%s2413_s4 + $0x58] sm:$0xf] %vm1301_vm3, %v1564_v51  ;;  %1356 = vst.msk [vmem:[%s2413_s4 + $0xd8] sm:$0xf] %vm1301_vm3, %v1596_v52  ;;  %v1565_v57 = vpack.c.bf16 %v1004_v53, %v1004_v53  ;;  %v870_v59 = vmul.f32 %v2018_v15, %v680_v55  ;;  %v902_v60 = vmul.f32 %v2018_v15, %v808_v56  ;;  %v682_v61 = vpop.f32.mrb[49].mxu0  ;;  %v810_v62 = vpop.f32.mrb[49].mxu1 }
 0x15e   :  { %v1597_v58 = vpack.c.bf16 %v1036_v54, %v1036_v54  ;;  %v683_v63 = vpop.f32.mrb[50].mxu0  ;;  %v811_v0 = vpop.f32.mrb[50].mxu1 }
 0x15f   :  { %1325 = vst.msk [vmem:[%s2413_s4 + $0x5c] sm:$0xf] %vm1301_vm3, %v1565_v57  ;;  %v941_v1 = vadd.f32 %v2023_v17, %v870_v59  ;;  %v973_v2 = vadd.f32 %v2023_v17, %v902_v60  ;;  %v871_v3 = vmul.f32 %v2018_v15, %v683_v63  ;;  %v903_v4 = vmul.f32 %v2018_v15, %v811_v0  ;;  %v685_v5 = vpop.f32.mrb[51].mxu0  ;;  %v813_v6 = vpop.f32.mrb[51].mxu1 }
 0x160   :  { %1357 = vst.msk [vmem:[%s2413_s4 + $0xdc] sm:$0xf] %vm1301_vm3, %v1597_v58 }
 0x161   :  { %v1005_v7 = vmax.f32 %v941_v1, 0.0  ;;  %v1037_v8 = vmax.f32 %v973_v2, 0.0  ;;  %v942_v9 = vadd.f32 %v2023_v17, %v871_v3  ;;  %v974_v10 = vadd.f32 %v2023_v17, %v903_v4 }
 0x163   :  { %v1566_v11 = vpack.c.bf16 %v1005_v7, %v1005_v7  ;;  %v1598_v12 = vpack.c.bf16 %v1037_v8, %v1037_v8  ;;  %v1006_v13 = vmax.f32 %v942_v9, 0.0  ;;  %v1038_v14 = vmax.f32 %v974_v10, 0.0 }
 0x164   :  { %v688_v16 = vpop.f32.mrb[52].mxu0  ;;  %v816_v18 = vpop.f32.mrb[52].mxu1 }
 0x165   :  { %1326 = vst.msk [vmem:[%s2413_s4 + $0x60] sm:$0xf] %vm1301_vm3, %v1566_v11  ;;  %1358 = vst.msk [vmem:[%s2413_s4 + $0xe0] sm:$0xf] %vm1301_vm3, %v1598_v12  ;;  %v1567_v19 = vpack.c.bf16 %v1006_v13, %v1006_v13  ;;  %v1599_v20 = vpack.c.bf16 %v1038_v14, %v1038_v14  ;;  %v872_v21 = vmul.f32 %v2018_v15, %v688_v16  ;;  %v690_v23 = vpop.f32.mrb[53].mxu0  ;;  %v818_v24 = vpop.f32.mrb[53].mxu1 }
 0x166   :  { %v904_v22 = vmul.f32 %v2018_v15, %v816_v18  ;;  %v691_v25 = vpop.f32.mrb[54].mxu0  ;;  %v819_v26 = vpop.f32.mrb[54].mxu1 }
 0x167   :  { %1327 = vst.msk [vmem:[%s2413_s4 + $0x64] sm:$0xf] %vm1301_vm3, %v1567_v19  ;;  %1359 = vst.msk [vmem:[%s2413_s4 + $0xe4] sm:$0xf] %vm1301_vm3, %v1599_v20  ;;  %v943_v27 = vadd.f32 %v2023_v17, %v872_v21  ;;  %v873_v29 = vmul.f32 %v2018_v15, %v691_v25  ;;  %v905_v30 = vmul.f32 %v2018_v15, %v819_v26  ;;  %v693_v31 = vpop.f32.mrb[55].mxu0  ;;  %v821_v32 = vpop.f32.mrb[55].mxu1 }
 0x168   :  { %v975_v28 = vadd.f32 %v2023_v17, %v904_v22 }
 0x169   :  { %v1007_v33 = vmax.f32 %v943_v27, 0.0  ;;  %v944_v35 = vadd.f32 %v2023_v17, %v873_v29  ;;  %v976_v36 = vadd.f32 %v2023_v17, %v905_v30 }
 0x16a   :  { %v1039_v34 = vmax.f32 %v975_v28, 0.0 }
 0x16b   :  { %v1568_v37 = vpack.c.bf16 %v1007_v33, %v1007_v33  ;;  %v1008_v39 = vmax.f32 %v944_v35, 0.0  ;;  %v1040_v40 = vmax.f32 %v976_v36, 0.0 }
 0x16c   :  { %v1600_v38 = vpack.c.bf16 %v1039_v34, %v1039_v34  ;;  %v696_v41 = vpop.f32.mrb[56].mxu0  ;;  %v824_v42 = vpop.f32.mrb[56].mxu1 }
 0x16d   :  { %1328 = vst.msk [vmem:[%s2413_s4 + $0x68] sm:$0xf] %vm1301_vm3, %v1568_v37  ;;  %v1569_v43 = vpack.c.bf16 %v1008_v39, %v1008_v39  ;;  %v1601_v44 = vpack.c.bf16 %v1040_v40, %v1040_v40  ;;  %v874_v45 = vmul.f32 %v2018_v15, %v696_v41  ;;  %v906_v46 = vmul.f32 %v2018_v15, %v824_v42  ;;  %v698_v47 = vpop.f32.mrb[57].mxu0  ;;  %v826_v48 = vpop.f32.mrb[57].mxu1 }
 0x16e   :  { %1360 = vst.msk [vmem:[%s2413_s4 + $0xe8] sm:$0xf] %vm1301_vm3, %v1600_v38  ;;  %v699_v49 = vpop.f32.mrb[58].mxu0  ;;  %v827_v50 = vpop.f32.mrb[58].mxu1 }
 0x16f   :  { %1329 = vst.msk [vmem:[%s2413_s4 + $0x6c] sm:$0xf] %vm1301_vm3, %v1569_v43  ;;  %1361 = vst.msk [vmem:[%s2413_s4 + $0xec] sm:$0xf] %vm1301_vm3, %v1601_v44  ;;  %v945_v51 = vadd.f32 %v2023_v17, %v874_v45  ;;  %v977_v52 = vadd.f32 %v2023_v17, %v906_v46  ;;  %v875_v53 = vmul.f32 %v2018_v15, %v699_v49  ;;  %v701_v55 = vpop.f32.mrb[59].mxu0  ;;  %v829_v56 = vpop.f32.mrb[59].mxu1 }
 0x170   :  { %v907_v54 = vmul.f32 %v2018_v15, %v827_v50 }
 0x171   :  { %v1009_v57 = vmax.f32 %v945_v51, 0.0  ;;  %v1041_v58 = vmax.f32 %v977_v52, 0.0  ;;  %v946_v59 = vadd.f32 %v2023_v17, %v875_v53 }
 0x172   :  { %v978_v60 = vadd.f32 %v2023_v17, %v907_v54 }
 0x173   :  { %v1570_v61 = vpack.c.bf16 %v1009_v57, %v1009_v57  ;;  %v1602_v62 = vpack.c.bf16 %v1041_v58, %v1041_v58  ;;  %v1010_v63 = vmax.f32 %v946_v59, 0.0 }
 0x174   :  { %v1042_v0 = vmax.f32 %v978_v60, 0.0  ;;  %v704_v1 = vpop.f32.mrb[60].mxu0  ;;  %v832_v2 = vpop.f32.mrb[60].mxu1 }
 0x175   :  { %1330 = vst.msk [vmem:[%s2413_s4 + $0x70] sm:$0xf] %vm1301_vm3, %v1570_v61  ;;  %1362 = vst.msk [vmem:[%s2413_s4 + $0xf0] sm:$0xf] %vm1301_vm3, %v1602_v62  ;;  %v1571_v3 = vpack.c.bf16 %v1010_v63, %v1010_v63  ;;  %v876_v5 = vmul.f32 %v2018_v15, %v704_v1  ;;  %v908_v6 = vmul.f32 %v2018_v15, %v832_v2  ;;  %v706_v7 = vpop.f32.mrb[61].mxu0  ;;  %v834_v8 = vpop.f32.mrb[61].mxu1 }
 0x176   :  { %v1603_v4 = vpack.c.bf16 %v1042_v0, %v1042_v0  ;;  %v707_v9 = vpop.f32.mrb[62].mxu0  ;;  %v835_v10 = vpop.f32.mrb[62].mxu1 }
 0x177   :  { %1331 = vst.msk [vmem:[%s2413_s4 + $0x74] sm:$0xf] %vm1301_vm3, %v1571_v3  ;;  %v947_v11 = vadd.f32 %v2023_v17, %v876_v5  ;;  %v979_v12 = vadd.f32 %v2023_v17, %v908_v6  ;;  %v877_v13 = vmul.f32 %v2018_v15, %v707_v9  ;;  %v909_v14 = vmul.f32 %v2018_v15, %v835_v10  ;;  %v709_v16 = vpop.f32.mrb[63].mxu0  ;;  %v837_v18 = vpop.f32.mrb[63].mxu1 }
 0x178   :  { %1363 = vst.msk [vmem:[%s2413_s4 + $0xf4] sm:$0xf] %vm1301_vm3, %v1603_v4 }
 0x179   :  { %v1011_v19 = vmax.f32 %v947_v11, 0.0  ;;  %v1043_v20 = vmax.f32 %v979_v12, 0.0  ;;  %v948_v21 = vadd.f32 %v2023_v17, %v877_v13  ;;  %v980_v22 = vadd.f32 %v2023_v17, %v909_v14 }
 0x17b   :  { %v1572_v23 = vpack.c.bf16 %v1011_v19, %v1011_v19  ;;  %v1604_v24 = vpack.c.bf16 %v1043_v20, %v1043_v20  ;;  %v1012_v25 = vmax.f32 %v948_v21, 0.0  ;;  %v1044_v26 = vmax.f32 %v980_v22, 0.0 }
 0x17d   :  { %1332 = vst.msk [vmem:[%s2413_s4 + $0x78] sm:$0xf] %vm1301_vm3, %v1572_v23  ;;  %1364 = vst.msk [vmem:[%s2413_s4 + $0xf8] sm:$0xf] %vm1301_vm3, %v1604_v24  ;;  %v1573_v15 = vpack.c.bf16 %v1012_v25, %v1012_v25  ;;  %v1605_v27 = vpack.c.bf16 %v1044_v26, %v1044_v26 }
 0x17f   :  { %1333 = vst.msk [vmem:[%s2413_s4 + $0x7c] sm:$0xf] %vm1301_vm3, %v1573_v15  ;;  %1365 = vst.msk [vmem:[%s2413_s4 + $0xfc] sm:$0xf] %vm1301_vm3, %v1605_v27 }

</bundles_post_ra>
